<compile_context>
chip_gen: v7x
topology: tpu7x:2x2x1
jax: 0.10.0
libtpu: 0.0.40
codegen_flags: <defaults>
</compile_context>

<pallas_src>
import numpy as np
import jax
import jax.numpy as jnp
from jax import lax
from jax.experimental import pallas as pl
from jax.experimental.pallas import tpu as pltpu

LEAKY_SLOPE = 0.2
BN_EPS = 0.8          # nn.BatchNorm2d(out_filters, 0.8) -> eps = 0.8


# ----------------------------- layer geometry ------------------------------ #

def _layer_cfg(img_size, channels):
    """Static per-layer shapes for the 4 downsample blocks."""
    chans = [channels + 1, 16, 32, 64, 128]
    cfg, h = [], img_size
    for l in range(4):
        ho = (h + 2 * 1 - 3) // 2 + 1           # conv 3x3, stride 2, pad 1
        cfg.append(dict(Hin=h, Win=h, Ho=ho, Wo=ho,
                        Cin=chans[l], Cout=chans[l + 1]))
        h = ho
    return cfg


def _gather_matrix(Hin, Win, Ho, Wo):
    """0/1 matrix (9*Ho*Wo, Hin*Win): row k*HoWo + (ho*Wo+wo) selects the
    spatially-flattened input pixel for tap k=(kh*3+kw) of output (ho,wo);
    zero row when the tap falls into the zero padding."""
    s_out = Ho * Wo
    g = np.zeros((9 * s_out, Hin * Win), np.float32)
    for kh in range(3):
        for kw in range(3):
            k = kh * 3 + kw
            for ho in range(Ho):
                for wo in range(Wo):
                    r = ho * Wo + wo
                    sr = 2 * ho + kh - 1
                    sc = 2 * wo + kw - 1
                    if 0 <= sr < Hin and 0 <= sc < Win:
                        g[k * s_out + r, sr * Win + sc] = 1.0
    return jnp.asarray(g)


# ------------------------------ fused kernel ------------------------------- #

def _make_kernel(cfg):
    n_layers = len(cfg)

    def kernel(*refs):
        x_ref = refs[0]
        layer_refs = refs[1:1 + 3 * n_layers]
        advw_ref = refs[1 + 3 * n_layers]
        advb_ref = refs[2 + 3 * n_layers]
        out_ref = refs[3 + 3 * n_layers]

        # Activation as a value: (spatial_flat, channels), channels on lanes.
        x2 = x_ref[0]                                         # (Hin*Win, Cin)

        for l, c in enumerate(cfg):
            g_ref = layer_refs[3 * l]                         # (9*HoWo, HinWin)
            w_ref = layer_refs[3 * l + 1]                     # (9*Cin, Cout)
            a_ref = layer_refs[3 * l + 2]                     # (3, Cout)
            s_out = c["Ho"] * c["Wo"]
            ci, co = c["Cin"], c["Cout"]

            # All 9 shifted/stride-2 taps with a single gather matmul (MXU).
            taps = jnp.dot(g_ref[...], x2,
                           preferred_element_type=jnp.float32)   # (9*s_out, ci)
            w2 = w_ref[...]

            y = jnp.zeros((s_out, co), jnp.float32)
            for k in range(9):                                   # static unroll
                y = y + jnp.dot(taps[k * s_out:(k + 1) * s_out, :],
                                w2[k * ci:(k + 1) * ci, :],
                                preferred_element_type=jnp.float32)

            aff = a_ref[...]
            y = y + aff[0:1, :]                                  # conv bias
            y = jnp.where(y >= 0.0, y, LEAKY_SLOPE * y)          # LeakyReLU(0.2)
            # Dropout2d: identity in eval mode.
            y = y * aff[1:2, :] + aff[2:3, :]                    # folded eval-BN
            x2 = y                                               # (HoWo, Cout)

        # Fused adv head: Linear(128*ds*ds, 1) as VPU mul + reduce, then Sigmoid.
        prod = x2 * advw_ref[...]                                # (ds*ds, 128)
        acc = jnp.sum(jnp.sum(prod, axis=1, keepdims=True),
                      axis=0, keepdims=True)                     # (1, 1)
        logit = acc + advb_ref[...]
        out_ref[...] = (1.0 / (1.0 + jnp.exp(-logit))).reshape(1, 1, 1)

    return kernel


def _build_pallas_call(cfg, batch):
    c0, cl = cfg[0], cfg[-1]
    s0 = c0["Hin"] * c0["Win"]
    ds2 = cl["Ho"] * cl["Wo"]

    in_specs = [pl.BlockSpec((1, s0, c0["Cin"]), lambda b: (b, 0, 0))]
    for c in cfg:
        s_out = c["Ho"] * c["Wo"]
        in_specs.append(pl.BlockSpec((9 * s_out, c["Hin"] * c["Win"]),
                                     lambda b: (0, 0)))          # gather matrix
        in_specs.append(pl.BlockSpec((9 * c["Cin"], c["Cout"]),
                                     lambda b: (0, 0)))          # conv weight
        in_specs.append(pl.BlockSpec((3, c["Cout"]), lambda b: (0, 0)))  # bias/BN
    in_specs.append(pl.BlockSpec((ds2, cl["Cout"]), lambda b: (0, 0)))   # adv w
    in_specs.append(pl.BlockSpec((1, 1), lambda b: (0, 0)))              # adv b

    out_specs = pl.BlockSpec((1, 1, 1), lambda b: (b, 0, 0))

    return pl.pallas_call(
        _make_kernel(cfg),
        out_shape=jax.ShapeDtypeStruct((batch, 1, 1), jnp.float32),
        grid=(batch,),
        in_specs=in_specs,
        out_specs=out_specs,
        compiler_params=pltpu.CompilerParams(dimension_semantics=("parallel",)),
    )


# --------------------------- parameter creation ----------------------------- #

def init_params(key, img_size, channels, n_classes):
    ks = jax.random.split(key, 13)

    def uni(k, shape, fan_in):
        bound = 1.0 / jnp.sqrt(float(fan_in))
        return jax.random.uniform(k, shape, jnp.float32, -bound, bound)

    p = {}
    # label_emb: Embedding(n_classes, n_classes) ~ N(0,1); label_l: Linear(n_classes, S^2).
    emb = jax.random.normal(ks[0], (n_classes, n_classes), jnp.float32)
    lw = uni(ks[1], (img_size ** 2, n_classes), n_classes)
    lb = uni(ks[2], (img_size ** 2,), n_classes)
    # Precompute label_l(label_emb(y)) for every class -> pure gather at run time.
    p["label_table"] = emb @ lw.T + lb                       # (n_classes, img_size^2)

    cfg = _layer_cfg(img_size, channels)
    chans = [channels + 1, 16, 32, 64, 128]
    convs, raw_convs, gathers = [], [], []
    for l, c in enumerate(cfg):
        cin, cout = chans[l], chans[l + 1]
        fan_in = cin * 9
        w = uni(ks[3 + 2 * l], (cout, cin, 3, 3), fan_in)    # PyTorch OIHW layout
        b = uni(ks[4 + 2 * l], (cout,), fan_in)
        # Fresh-module BatchNorm2d(cout, eps=0.8) eval-mode running stats / affine.
        if l == 0:                                           # first block: bn=False
            scale = jnp.ones((cout,), jnp.float32)
            shift = jnp.zeros((cout,), jnp.float32)
        else:                                                # folded eval BatchNorm
            gamma = jnp.ones((cout,), jnp.float32)
            beta = jnp.zeros((cout,), jnp.float32)
            mean = jnp.zeros((cout,), jnp.float32)
            var = jnp.ones((cout,), jnp.float32)
            scale = gamma / jnp.sqrt(var + BN_EPS)
            shift = beta - mean * scale
        # Row index = (kh*3+kw)*Cin + ci  -> matches gather-matrix tap ordering.
        w2 = jnp.transpose(w, (2, 3, 1, 0)).reshape(9 * cin, cout)
        affine = jnp.stack([b, scale, shift], axis=0)        # (3, Cout)
        convs.append((w2, affine))
        raw_convs.append((w, b, scale, shift))
        gathers.append(_gather_matrix(c["Hin"], c["Win"], c["Ho"], c["Wo"]))
    p["convs"] = convs
    p["raw_convs"] = raw_convs                               # only for the reference
    p["gathers"] = gathers

    dsz = img_size // 2 ** 4
    feat = 128 * dsz * dsz
    aw = uni(ks[11], (1, feat), feat)
    ab = uni(ks[12], (1,), feat)
    # Re-arrange adv weight to (h*ds+w, c) so the fused head matches torch's
    # NCHW flatten order (c, h, w) without any in-kernel reordering.
    p["adv_w"] = jnp.transpose(aw.reshape(128, dsz * dsz), (1, 0))  # (ds*ds, 128)
    p["adv_b"] = ab.reshape(1, 1)
    p["adv_w_raw"] = aw
    p["adv_b_raw"] = ab
    return p


# ------------------------------ forward pass -------------------------------- #

@jax.jit
def cgan_discriminator_forward(params, img, label):
    B, C, H, W = img.shape
    cfg = _layer_cfg(H, C)
    # Label path: precomputed Embedding+Linear table -> pure gather.
    lbl_plane = params["label_table"][label].reshape(B, H, W, 1)
    x = jnp.concatenate([jnp.transpose(img, (0, 2, 3, 1)), lbl_plane], axis=-1)
    x = x.reshape(B, H * W, C + 1)                           # spatial-flattened NHWC
    args = [x]
    for g, (w2, aff) in zip(params["gathers"], params["convs"]):
        args += [g, w2, aff]
    args += [params["adv_w"], params["adv_b"]]
    out = _build_pallas_call(cfg, B)(*args)
    return out.reshape(B, 1)


# ----------------------- pure-JAX reference (eval mode) --------------------- #

def reference_forward(params, img, label):
    B, C, H, W = img.shape
    lbl = params["label_table"][label].reshape(B, 1, H, W)
    x = jnp.concatenate([img, lbl], axis=1)                  # NCHW
    for w, b, scale, shift in params["raw_convs"]:
        x = lax.conv_general_dilated(
            x, w, window_strides=(2, 2), padding=((1, 1), (1, 1)),
            dimension_numbers=("NCHW", "OIHW", "NCHW"),
            precision=lax.Precision.HIGHEST)
        x = x + b.reshape(1, -1, 1, 1)
        x = jnp.where(x >= 0.0, x, LEAKY_SLOPE * x)
        x = x * scale.reshape(1, -1, 1, 1) + shift.reshape(1, -1, 1, 1)
    x = x.reshape(B, -1)
    logit = jnp.dot(x, params["adv_w_raw"].T,
                    precision=lax.Precision.HIGHEST) + params["adv_b_raw"]
    return jax.nn.sigmoid(logit)


# ---------------------------------- main ------------------------------------ #

if __name__ == "__main__":
    img_size, channels, n_classes, batch = 16, 3, 4, 2

    key = jax.random.PRNGKey(0)
    k_params, k_img, k_lab = jax.random.split(key, 3)

    params = init_params(k_params, img_size, channels, n_classes)
    img = jax.random.normal(k_img, (batch, channels, img_size, img_size), jnp.float32)
    label = jax.random.randint(k_lab, (batch,), 0, n_classes)

    validity = cgan_discriminator_forward(params, img, label)
    validity = jax.block_until_ready(validity)

    assert validity.shape == (batch, 1)
    assert bool(jnp.all(jnp.isfinite(validity)))
    assert bool(jnp.all((validity >= 0.0) & (validity <= 1.0)))

    ref = reference_forward(params, img, label)
    assert bool(jnp.allclose(validity, ref, atol=2e-3, rtol=2e-3)), (validity, ref)

    print("KERNEL_OK")
</pallas_src>

<mosaic_0001>
module attributes {stable_mosaic.version = 11 : i64} {
  func.func @kernel(%arg0: i32, %arg1: memref<1x256x4xf32, #tpu.memory_space<vmem>>, %arg2: memref<576x256xf32, #tpu.memory_space<vmem>>, %arg3: memref<36x16xf32, #tpu.memory_space<vmem>>, %arg4: memref<3x16xf32, #tpu.memory_space<vmem>>, %arg5: memref<144x64xf32, #tpu.memory_space<vmem>>, %arg6: memref<144x32xf32, #tpu.memory_space<vmem>>, %arg7: memref<3x32xf32, #tpu.memory_space<vmem>>, %arg8: memref<36x16xf32, #tpu.memory_space<vmem>>, %arg9: memref<288x64xf32, #tpu.memory_space<vmem>>, %arg10: memref<3x64xf32, #tpu.memory_space<vmem>>, %arg11: memref<9x4xf32, #tpu.memory_space<vmem>>, %arg12: memref<576x128xf32, #tpu.memory_space<vmem>>, %arg13: memref<3x128xf32, #tpu.memory_space<vmem>>, %arg14: memref<1x128xf32, #tpu.memory_space<vmem>>, %arg15: memref<1x1xf32, #tpu.memory_space<vmem>>, %arg16: memref<1x1x1xf32, #tpu.memory_space<vmem>>) attributes {dimension_semantics = [#tpu.dimension_semantics<parallel>], iteration_bounds = array<i64: 2>, scalar_prefetch = 0 : i64, scratch_operands = 0 : i64, tpu.core_type = #tpu.core_type<tc>, window_params = [{transform_indices = @transform_0, window_bounds = array<i64: 1, 256, 4>}, {pipeline_mode = #tpu.pipeline_mode<synchronous>, transform_indices = @transform_1, window_bounds = array<i64: 576, 256>}, {pipeline_mode = #tpu.pipeline_mode<synchronous>, transform_indices = @transform_2, window_bounds = array<i64: 36, 16>}, {pipeline_mode = #tpu.pipeline_mode<synchronous>, transform_indices = @transform_3, window_bounds = array<i64: 3, 16>}, {pipeline_mode = #tpu.pipeline_mode<synchronous>, transform_indices = @transform_4, window_bounds = array<i64: 144, 64>}, {pipeline_mode = #tpu.pipeline_mode<synchronous>, transform_indices = @transform_5, window_bounds = array<i64: 144, 32>}, {pipeline_mode = #tpu.pipeline_mode<synchronous>, transform_indices = @transform_6, window_bounds = array<i64: 3, 32>}, {pipeline_mode = #tpu.pipeline_mode<synchronous>, transform_indices = @transform_7, window_bounds = array<i64: 36, 16>}, {pipeline_mode = #tpu.pipeline_mode<synchronous>, transform_indices = @transform_8, window_bounds = array<i64: 288, 64>}, {pipeline_mode = #tpu.pipeline_mode<synchronous>, transform_indices = @transform_9, window_bounds = array<i64: 3, 64>}, {pipeline_mode = #tpu.pipeline_mode<synchronous>, transform_indices = @transform_10, window_bounds = array<i64: 9, 4>}, {pipeline_mode = #tpu.pipeline_mode<synchronous>, transform_indices = @transform_11, window_bounds = array<i64: 576, 128>}, {pipeline_mode = #tpu.pipeline_mode<synchronous>, transform_indices = @transform_12, window_bounds = array<i64: 3, 128>}, {pipeline_mode = #tpu.pipeline_mode<synchronous>, transform_indices = @transform_13, window_bounds = array<i64: 1, 128>}, {pipeline_mode = #tpu.pipeline_mode<synchronous>, transform_indices = @transform_14, window_bounds = array<i64: 1, 1>}, {transform_indices = @transform_15, window_bounds = array<i64: 1, 1, 1>}]} {
    %c0 = arith.constant 0 : index
    %c0_0 = arith.constant 0 : index
    %c0_1 = arith.constant 0 : index
    %0 = vector.load %arg1[%c0, %c0_0, %c0_1] : memref<1x256x4xf32, #tpu.memory_space<vmem>>, vector<1x256x4xf32>
    %1 = vector.shape_cast %0 : vector<1x256x4xf32> to vector<256x4xf32>
    %c0_2 = arith.constant 0 : index
    %c0_3 = arith.constant 0 : index
    %2 = vector.load %arg2[%c0_2, %c0_3] : memref<576x256xf32, #tpu.memory_space<vmem>>, vector<576x256xf32>
    %cst = arith.constant dense<0.000000e+00> : vector<576x4xf32>
    %3 = tpu.matmul %2, %1, %cst {dimension_numbers = #tpu.dot_dimension_numbers<[1], [0], [0], [1], [0, 0, 1, 1], [], []>} : vector<576x256xf32>, vector<256x4xf32>, vector<576x4xf32> -> vector<576x4xf32>
    %c0_4 = arith.constant 0 : index
    %c0_5 = arith.constant 0 : index
    %4 = vector.load %arg3[%c0_4, %c0_5] : memref<36x16xf32, #tpu.memory_space<vmem>>, vector<36x16xf32>
    %cst_6 = arith.constant 0.000000e+00 : f32
    %5 = vector.broadcast %cst_6 : f32 to vector<64x16xf32>
    %6 = vector.extract_strided_slice %3 {offsets = [0, 0], sizes = [64, 4], strides = [1, 1]} : vector<576x4xf32> to vector<64x4xf32>
    %7 = vector.extract_strided_slice %4 {offsets = [0, 0], sizes = [4, 16], strides = [1, 1]} : vector<36x16xf32> to vector<4x16xf32>
    %cst_7 = arith.constant dense<0.000000e+00> : vector<64x16xf32>
    %8 = tpu.matmul %6, %7, %cst_7 {dimension_numbers = #tpu.dot_dimension_numbers<[1], [0], [0], [1], [0, 0, 1, 1], [], []>} : vector<64x4xf32>, vector<4x16xf32>, vector<64x16xf32> -> vector<64x16xf32>
    %9 = arith.addf %5, %8 : vector<64x16xf32>
    %10 = vector.extract_strided_slice %3 {offsets = [64, 0], sizes = [64, 4], strides = [1, 1]} : vector<576x4xf32> to vector<64x4xf32>
    %11 = vector.extract_strided_slice %4 {offsets = [4, 0], sizes = [4, 16], strides = [1, 1]} : vector<36x16xf32> to vector<4x16xf32>
    %cst_8 = arith.constant dense<0.000000e+00> : vector<64x16xf32>
    %12 = tpu.matmul %10, %11, %cst_8 {dimension_numbers = #tpu.dot_dimension_numbers<[1], [0], [0], [1], [0, 0, 1, 1], [], []>} : vector<64x4xf32>, vector<4x16xf32>, vector<64x16xf32> -> vector<64x16xf32>
    %13 = arith.addf %9, %12 : vector<64x16xf32>
    %14 = vector.extract_strided_slice %3 {offsets = [128, 0], sizes = [64, 4], strides = [1, 1]} : vector<576x4xf32> to vector<64x4xf32>
    %15 = vector.extract_strided_slice %4 {offsets = [8, 0], sizes = [4, 16], strides = [1, 1]} : vector<36x16xf32> to vector<4x16xf32>
    %cst_9 = arith.constant dense<0.000000e+00> : vector<64x16xf32>
    %16 = tpu.matmul %14, %15, %cst_9 {dimension_numbers = #tpu.dot_dimension_numbers<[1], [0], [0], [1], [0, 0, 1, 1], [], []>} : vector<64x4xf32>, vector<4x16xf32>, vector<64x16xf32> -> vector<64x16xf32>
    %17 = arith.addf %13, %16 : vector<64x16xf32>
    %18 = vector.extract_strided_slice %3 {offsets = [192, 0], sizes = [64, 4], strides = [1, 1]} : vector<576x4xf32> to vector<64x4xf32>
    %19 = vector.extract_strided_slice %4 {offsets = [12, 0], sizes = [4, 16], strides = [1, 1]} : vector<36x16xf32> to vector<4x16xf32>
    %cst_10 = arith.constant dense<0.000000e+00> : vector<64x16xf32>
    %20 = tpu.matmul %18, %19, %cst_10 {dimension_numbers = #tpu.dot_dimension_numbers<[1], [0], [0], [1], [0, 0, 1, 1], [], []>} : vector<64x4xf32>, vector<4x16xf32>, vector<64x16xf32> -> vector<64x16xf32>
    %21 = arith.addf %17, %20 : vector<64x16xf32>
    %22 = vector.extract_strided_slice %3 {offsets = [256, 0], sizes = [64, 4], strides = [1, 1]} : vector<576x4xf32> to vector<64x4xf32>
    %23 = vector.extract_strided_slice %4 {offsets = [16, 0], sizes = [4, 16], strides = [1, 1]} : vector<36x16xf32> to vector<4x16xf32>
    %cst_11 = arith.constant dense<0.000000e+00> : vector<64x16xf32>
    %24 = tpu.matmul %22, %23, %cst_11 {dimension_numbers = #tpu.dot_dimension_numbers<[1], [0], [0], [1], [0, 0, 1, 1], [], []>} : vector<64x4xf32>, vector<4x16xf32>, vector<64x16xf32> -> vector<64x16xf32>
    %25 = arith.addf %21, %24 : vector<64x16xf32>
    %26 = vector.extract_strided_slice %3 {offsets = [320, 0], sizes = [64, 4], strides = [1, 1]} : vector<576x4xf32> to vector<64x4xf32>
    %27 = vector.extract_strided_slice %4 {offsets = [20, 0], sizes = [4, 16], strides = [1, 1]} : vector<36x16xf32> to vector<4x16xf32>
    %cst_12 = arith.constant dense<0.000000e+00> : vector<64x16xf32>
    %28 = tpu.matmul %26, %27, %cst_12 {dimension_numbers = #tpu.dot_dimension_numbers<[1], [0], [0], [1], [0, 0, 1, 1], [], []>} : vector<64x4xf32>, vector<4x16xf32>, vector<64x16xf32> -> vector<64x16xf32>
    %29 = arith.addf %25, %28 : vector<64x16xf32>
    %30 = vector.extract_strided_slice %3 {offsets = [384, 0], sizes = [64, 4], strides = [1, 1]} : vector<576x4xf32> to vector<64x4xf32>
    %31 = vector.extract_strided_slice %4 {offsets = [24, 0], sizes = [4, 16], strides = [1, 1]} : vector<36x16xf32> to vector<4x16xf32>
    %cst_13 = arith.constant dense<0.000000e+00> : vector<64x16xf32>
    %32 = tpu.matmul %30, %31, %cst_13 {dimension_numbers = #tpu.dot_dimension_numbers<[1], [0], [0], [1], [0, 0, 1, 1], [], []>} : vector<64x4xf32>, vector<4x16xf32>, vector<64x16xf32> -> vector<64x16xf32>
    %33 = arith.addf %29, %32 : vector<64x16xf32>
    %34 = vector.extract_strided_slice %3 {offsets = [448, 0], sizes = [64, 4], strides = [1, 1]} : vector<576x4xf32> to vector<64x4xf32>
    %35 = vector.extract_strided_slice %4 {offsets = [28, 0], sizes = [4, 16], strides = [1, 1]} : vector<36x16xf32> to vector<4x16xf32>
    %cst_14 = arith.constant dense<0.000000e+00> : vector<64x16xf32>
    %36 = tpu.matmul %34, %35, %cst_14 {dimension_numbers = #tpu.dot_dimension_numbers<[1], [0], [0], [1], [0, 0, 1, 1], [], []>} : vector<64x4xf32>, vector<4x16xf32>, vector<64x16xf32> -> vector<64x16xf32>
    %37 = arith.addf %33, %36 : vector<64x16xf32>
    %38 = vector.extract_strided_slice %3 {offsets = [512, 0], sizes = [64, 4], strides = [1, 1]} : vector<576x4xf32> to vector<64x4xf32>
    %39 = vector.extract_strided_slice %4 {offsets = [32, 0], sizes = [4, 16], strides = [1, 1]} : vector<36x16xf32> to vector<4x16xf32>
    %cst_15 = arith.constant dense<0.000000e+00> : vector<64x16xf32>
    %40 = tpu.matmul %38, %39, %cst_15 {dimension_numbers = #tpu.dot_dimension_numbers<[1], [0], [0], [1], [0, 0, 1, 1], [], []>} : vector<64x4xf32>, vector<4x16xf32>, vector<64x16xf32> -> vector<64x16xf32>
    %41 = arith.addf %37, %40 : vector<64x16xf32>
    %c0_16 = arith.constant 0 : index
    %c0_17 = arith.constant 0 : index
    %42 = vector.load %arg4[%c0_16, %c0_17] : memref<3x16xf32, #tpu.memory_space<vmem>>, vector<3x16xf32>
    %43 = vector.extract_strided_slice %42 {offsets = [0, 0], sizes = [1, 16], strides = [1, 1]} : vector<3x16xf32> to vector<1x16xf32>
    %44 = vector.broadcast %43 : vector<1x16xf32> to vector<64x16xf32>
    %45 = arith.addf %41, %44 : vector<64x16xf32>
    %cst_18 = arith.constant 0.000000e+00 : f32
    %46 = vector.broadcast %cst_18 : f32 to vector<64x16xf32>
    %47 = arith.cmpf oge, %45, %46 : vector<64x16xf32>
    %cst_19 = arith.constant 2.000000e-01 : f32
    %48 = vector.broadcast %cst_19 : f32 to vector<64x16xf32>
    %49 = arith.mulf %48, %45 : vector<64x16xf32>
    %50 = arith.select %47, %45, %49 : vector<64x16xi1>, vector<64x16xf32>
    %51 = vector.extract_strided_slice %42 {offsets = [1, 0], sizes = [1, 16], strides = [1, 1]} : vector<3x16xf32> to vector<1x16xf32>
    %52 = vector.broadcast %51 : vector<1x16xf32> to vector<64x16xf32>
    %53 = arith.mulf %50, %52 : vector<64x16xf32>
    %54 = vector.extract_strided_slice %42 {offsets = [2, 0], sizes = [1, 16], strides = [1, 1]} : vector<3x16xf32> to vector<1x16xf32>
    %55 = vector.broadcast %54 : vector<1x16xf32> to vector<64x16xf32>
    %56 = arith.addf %53, %55 : vector<64x16xf32>
    %c0_20 = arith.constant 0 : index
    %c0_21 = arith.constant 0 : index
    %57 = vector.load %arg5[%c0_20, %c0_21] : memref<144x64xf32, #tpu.memory_space<vmem>>, vector<144x64xf32>
    %cst_22 = arith.constant dense<0.000000e+00> : vector<144x16xf32>
    %58 = tpu.matmul %57, %56, %cst_22 {dimension_numbers = #tpu.dot_dimension_numbers<[1], [0], [0], [1], [0, 0, 1, 1], [], []>} : vector<144x64xf32>, vector<64x16xf32>, vector<144x16xf32> -> vector<144x16xf32>
    %c0_23 = arith.constant 0 : index
    %c0_24 = arith.constant 0 : index
    %59 = vector.load %arg6[%c0_23, %c0_24] : memref<144x32xf32, #tpu.memory_space<vmem>>, vector<144x32xf32>
    %cst_25 = arith.constant 0.000000e+00 : f32
    %60 = vector.broadcast %cst_25 : f32 to vector<16x32xf32>
    %61 = vector.extract_strided_slice %58 {offsets = [0, 0], sizes = [16, 16], strides = [1, 1]} : vector<144x16xf32> to vector<16x16xf32>
    %62 = vector.extract_strided_slice %59 {offsets = [0, 0], sizes = [16, 32], strides = [1, 1]} : vector<144x32xf32> to vector<16x32xf32>
    %cst_26 = arith.constant dense<0.000000e+00> : vector<16x32xf32>
    %63 = tpu.matmul %61, %62, %cst_26 {dimension_numbers = #tpu.dot_dimension_numbers<[1], [0], [0], [1], [0, 0, 1, 1], [], []>} : vector<16x16xf32>, vector<16x32xf32>, vector<16x32xf32> -> vector<16x32xf32>
    %64 = arith.addf %60, %63 : vector<16x32xf32>
    %65 = vector.extract_strided_slice %58 {offsets = [16, 0], sizes = [16, 16], strides = [1, 1]} : vector<144x16xf32> to vector<16x16xf32>
    %66 = vector.extract_strided_slice %59 {offsets = [16, 0], sizes = [16, 32], strides = [1, 1]} : vector<144x32xf32> to vector<16x32xf32>
    %cst_27 = arith.constant dense<0.000000e+00> : vector<16x32xf32>
    %67 = tpu.matmul %65, %66, %cst_27 {dimension_numbers = #tpu.dot_dimension_numbers<[1], [0], [0], [1], [0, 0, 1, 1], [], []>} : vector<16x16xf32>, vector<16x32xf32>, vector<16x32xf32> -> vector<16x32xf32>
    %68 = arith.addf %64, %67 : vector<16x32xf32>
    %69 = vector.extract_strided_slice %58 {offsets = [32, 0], sizes = [16, 16], strides = [1, 1]} : vector<144x16xf32> to vector<16x16xf32>
    %70 = vector.extract_strided_slice %59 {offsets = [32, 0], sizes = [16, 32], strides = [1, 1]} : vector<144x32xf32> to vector<16x32xf32>
    %cst_28 = arith.constant dense<0.000000e+00> : vector<16x32xf32>
    %71 = tpu.matmul %69, %70, %cst_28 {dimension_numbers = #tpu.dot_dimension_numbers<[1], [0], [0], [1], [0, 0, 1, 1], [], []>} : vector<16x16xf32>, vector<16x32xf32>, vector<16x32xf32> -> vector<16x32xf32>
    %72 = arith.addf %68, %71 : vector<16x32xf32>
    %73 = vector.extract_strided_slice %58 {offsets = [48, 0], sizes = [16, 16], strides = [1, 1]} : vector<144x16xf32> to vector<16x16xf32>
    %74 = vector.extract_strided_slice %59 {offsets = [48, 0], sizes = [16, 32], strides = [1, 1]} : vector<144x32xf32> to vector<16x32xf32>
    %cst_29 = arith.constant dense<0.000000e+00> : vector<16x32xf32>
    %75 = tpu.matmul %73, %74, %cst_29 {dimension_numbers = #tpu.dot_dimension_numbers<[1], [0], [0], [1], [0, 0, 1, 1], [], []>} : vector<16x16xf32>, vector<16x32xf32>, vector<16x32xf32> -> vector<16x32xf32>
    %76 = arith.addf %72, %75 : vector<16x32xf32>
    %77 = vector.extract_strided_slice %58 {offsets = [64, 0], sizes = [16, 16], strides = [1, 1]} : vector<144x16xf32> to vector<16x16xf32>
    %78 = vector.extract_strided_slice %59 {offsets = [64, 0], sizes = [16, 32], strides = [1, 1]} : vector<144x32xf32> to vector<16x32xf32>
    %cst_30 = arith.constant dense<0.000000e+00> : vector<16x32xf32>
    %79 = tpu.matmul %77, %78, %cst_30 {dimension_numbers = #tpu.dot_dimension_numbers<[1], [0], [0], [1], [0, 0, 1, 1], [], []>} : vector<16x16xf32>, vector<16x32xf32>, vector<16x32xf32> -> vector<16x32xf32>
    %80 = arith.addf %76, %79 : vector<16x32xf32>
    %81 = vector.extract_strided_slice %58 {offsets = [80, 0], sizes = [16, 16], strides = [1, 1]} : vector<144x16xf32> to vector<16x16xf32>
    %82 = vector.extract_strided_slice %59 {offsets = [80, 0], sizes = [16, 32], strides = [1, 1]} : vector<144x32xf32> to vector<16x32xf32>
    %cst_31 = arith.constant dense<0.000000e+00> : vector<16x32xf32>
    %83 = tpu.matmul %81, %82, %cst_31 {dimension_numbers = #tpu.dot_dimension_numbers<[1], [0], [0], [1], [0, 0, 1, 1], [], []>} : vector<16x16xf32>, vector<16x32xf32>, vector<16x32xf32> -> vector<16x32xf32>
    %84 = arith.addf %80, %83 : vector<16x32xf32>
    %85 = vector.extract_strided_slice %58 {offsets = [96, 0], sizes = [16, 16], strides = [1, 1]} : vector<144x16xf32> to vector<16x16xf32>
    %86 = vector.extract_strided_slice %59 {offsets = [96, 0], sizes = [16, 32], strides = [1, 1]} : vector<144x32xf32> to vector<16x32xf32>
    %cst_32 = arith.constant dense<0.000000e+00> : vector<16x32xf32>
    %87 = tpu.matmul %85, %86, %cst_32 {dimension_numbers = #tpu.dot_dimension_numbers<[1], [0], [0], [1], [0, 0, 1, 1], [], []>} : vector<16x16xf32>, vector<16x32xf32>, vector<16x32xf32> -> vector<16x32xf32>
    %88 = arith.addf %84, %87 : vector<16x32xf32>
    %89 = vector.extract_strided_slice %58 {offsets = [112, 0], sizes = [16, 16], strides = [1, 1]} : vector<144x16xf32> to vector<16x16xf32>
    %90 = vector.extract_strided_slice %59 {offsets = [112, 0], sizes = [16, 32], strides = [1, 1]} : vector<144x32xf32> to vector<16x32xf32>
    %cst_33 = arith.constant dense<0.000000e+00> : vector<16x32xf32>
    %91 = tpu.matmul %89, %90, %cst_33 {dimension_numbers = #tpu.dot_dimension_numbers<[1], [0], [0], [1], [0, 0, 1, 1], [], []>} : vector<16x16xf32>, vector<16x32xf32>, vector<16x32xf32> -> vector<16x32xf32>
    %92 = arith.addf %88, %91 : vector<16x32xf32>
    %93 = vector.extract_strided_slice %58 {offsets = [128, 0], sizes = [16, 16], strides = [1, 1]} : vector<144x16xf32> to vector<16x16xf32>
    %94 = vector.extract_strided_slice %59 {offsets = [128, 0], sizes = [16, 32], strides = [1, 1]} : vector<144x32xf32> to vector<16x32xf32>
    %cst_34 = arith.constant dense<0.000000e+00> : vector<16x32xf32>
    %95 = tpu.matmul %93, %94, %cst_34 {dimension_numbers = #tpu.dot_dimension_numbers<[1], [0], [0], [1], [0, 0, 1, 1], [], []>} : vector<16x16xf32>, vector<16x32xf32>, vector<16x32xf32> -> vector<16x32xf32>
    %96 = arith.addf %92, %95 : vector<16x32xf32>
    %c0_35 = arith.constant 0 : index
    %c0_36 = arith.constant 0 : index
    %97 = vector.load %arg7[%c0_35, %c0_36] : memref<3x32xf32, #tpu.memory_space<vmem>>, vector<3x32xf32>
    %98 = vector.extract_strided_slice %97 {offsets = [0, 0], sizes = [1, 32], strides = [1, 1]} : vector<3x32xf32> to vector<1x32xf32>
    %99 = vector.broadcast %98 : vector<1x32xf32> to vector<16x32xf32>
    %100 = arith.addf %96, %99 : vector<16x32xf32>
    %cst_37 = arith.constant 0.000000e+00 : f32
    %101 = vector.broadcast %cst_37 : f32 to vector<16x32xf32>
    %102 = arith.cmpf oge, %100, %101 : vector<16x32xf32>
    %cst_38 = arith.constant 2.000000e-01 : f32
    %103 = vector.broadcast %cst_38 : f32 to vector<16x32xf32>
    %104 = arith.mulf %103, %100 : vector<16x32xf32>
    %105 = arith.select %102, %100, %104 : vector<16x32xi1>, vector<16x32xf32>
    %106 = vector.extract_strided_slice %97 {offsets = [1, 0], sizes = [1, 32], strides = [1, 1]} : vector<3x32xf32> to vector<1x32xf32>
    %107 = vector.broadcast %106 : vector<1x32xf32> to vector<16x32xf32>
    %108 = arith.mulf %105, %107 : vector<16x32xf32>
    %109 = vector.extract_strided_slice %97 {offsets = [2, 0], sizes = [1, 32], strides = [1, 1]} : vector<3x32xf32> to vector<1x32xf32>
    %110 = vector.broadcast %109 : vector<1x32xf32> to vector<16x32xf32>
    %111 = arith.addf %108, %110 : vector<16x32xf32>
    %c0_39 = arith.constant 0 : index
    %c0_40 = arith.constant 0 : index
    %112 = vector.load %arg8[%c0_39, %c0_40] : memref<36x16xf32, #tpu.memory_space<vmem>>, vector<36x16xf32>
    %cst_41 = arith.constant dense<0.000000e+00> : vector<36x32xf32>
    %113 = tpu.matmul %112, %111, %cst_41 {dimension_numbers = #tpu.dot_dimension_numbers<[1], [0], [0], [1], [0, 0, 1, 1], [], []>} : vector<36x16xf32>, vector<16x32xf32>, vector<36x32xf32> -> vector<36x32xf32>
    %c0_42 = arith.constant 0 : index
    %c0_43 = arith.constant 0 : index
    %114 = vector.load %arg9[%c0_42, %c0_43] : memref<288x64xf32, #tpu.memory_space<vmem>>, vector<288x64xf32>
    %cst_44 = arith.constant 0.000000e+00 : f32
    %115 = vector.broadcast %cst_44 : f32 to vector<4x64xf32>
    %116 = vector.extract_strided_slice %113 {offsets = [0, 0], sizes = [4, 32], strides = [1, 1]} : vector<36x32xf32> to vector<4x32xf32>
    %117 = vector.extract_strided_slice %114 {offsets = [0, 0], sizes = [32, 64], strides = [1, 1]} : vector<288x64xf32> to vector<32x64xf32>
    %cst_45 = arith.constant dense<0.000000e+00> : vector<4x64xf32>
    %118 = tpu.matmul %116, %117, %cst_45 {dimension_numbers = #tpu.dot_dimension_numbers<[1], [0], [0], [1], [0, 0, 1, 1], [], []>} : vector<4x32xf32>, vector<32x64xf32>, vector<4x64xf32> -> vector<4x64xf32>
    %119 = arith.addf %115, %118 : vector<4x64xf32>
    %120 = vector.extract_strided_slice %113 {offsets = [4, 0], sizes = [4, 32], strides = [1, 1]} : vector<36x32xf32> to vector<4x32xf32>
    %121 = vector.extract_strided_slice %114 {offsets = [32, 0], sizes = [32, 64], strides = [1, 1]} : vector<288x64xf32> to vector<32x64xf32>
    %cst_46 = arith.constant dense<0.000000e+00> : vector<4x64xf32>
    %122 = tpu.matmul %120, %121, %cst_46 {dimension_numbers = #tpu.dot_dimension_numbers<[1], [0], [0], [1], [0, 0, 1, 1], [], []>} : vector<4x32xf32>, vector<32x64xf32>, vector<4x64xf32> -> vector<4x64xf32>
    %123 = arith.addf %119, %122 : vector<4x64xf32>
    %124 = vector.extract_strided_slice %113 {offsets = [8, 0], sizes = [4, 32], strides = [1, 1]} : vector<36x32xf32> to vector<4x32xf32>
    %125 = vector.extract_strided_slice %114 {offsets = [64, 0], sizes = [32, 64], strides = [1, 1]} : vector<288x64xf32> to vector<32x64xf32>
    %cst_47 = arith.constant dense<0.000000e+00> : vector<4x64xf32>
    %126 = tpu.matmul %124, %125, %cst_47 {dimension_numbers = #tpu.dot_dimension_numbers<[1], [0], [0], [1], [0, 0, 1, 1], [], []>} : vector<4x32xf32>, vector<32x64xf32>, vector<4x64xf32> -> vector<4x64xf32>
    %127 = arith.addf %123, %126 : vector<4x64xf32>
    %128 = vector.extract_strided_slice %113 {offsets = [12, 0], sizes = [4, 32], strides = [1, 1]} : vector<36x32xf32> to vector<4x32xf32>
    %129 = vector.extract_strided_slice %114 {offsets = [96, 0], sizes = [32, 64], strides = [1, 1]} : vector<288x64xf32> to vector<32x64xf32>
    %cst_48 = arith.constant dense<0.000000e+00> : vector<4x64xf32>
    %130 = tpu.matmul %128, %129, %cst_48 {dimension_numbers = #tpu.dot_dimension_numbers<[1], [0], [0], [1], [0, 0, 1, 1], [], []>} : vector<4x32xf32>, vector<32x64xf32>, vector<4x64xf32> -> vector<4x64xf32>
    %131 = arith.addf %127, %130 : vector<4x64xf32>
    %132 = vector.extract_strided_slice %113 {offsets = [16, 0], sizes = [4, 32], strides = [1, 1]} : vector<36x32xf32> to vector<4x32xf32>
    %133 = vector.extract_strided_slice %114 {offsets = [128, 0], sizes = [32, 64], strides = [1, 1]} : vector<288x64xf32> to vector<32x64xf32>
    %cst_49 = arith.constant dense<0.000000e+00> : vector<4x64xf32>
    %134 = tpu.matmul %132, %133, %cst_49 {dimension_numbers = #tpu.dot_dimension_numbers<[1], [0], [0], [1], [0, 0, 1, 1], [], []>} : vector<4x32xf32>, vector<32x64xf32>, vector<4x64xf32> -> vector<4x64xf32>
    %135 = arith.addf %131, %134 : vector<4x64xf32>
    %136 = vector.extract_strided_slice %113 {offsets = [20, 0], sizes = [4, 32], strides = [1, 1]} : vector<36x32xf32> to vector<4x32xf32>
    %137 = vector.extract_strided_slice %114 {offsets = [160, 0], sizes = [32, 64], strides = [1, 1]} : vector<288x64xf32> to vector<32x64xf32>
    %cst_50 = arith.constant dense<0.000000e+00> : vector<4x64xf32>
    %138 = tpu.matmul %136, %137, %cst_50 {dimension_numbers = #tpu.dot_dimension_numbers<[1], [0], [0], [1], [0, 0, 1, 1], [], []>} : vector<4x32xf32>, vector<32x64xf32>, vector<4x64xf32> -> vector<4x64xf32>
    %139 = arith.addf %135, %138 : vector<4x64xf32>
    %140 = vector.extract_strided_slice %113 {offsets = [24, 0], sizes = [4, 32], strides = [1, 1]} : vector<36x32xf32> to vector<4x32xf32>
    %141 = vector.extract_strided_slice %114 {offsets = [192, 0], sizes = [32, 64], strides = [1, 1]} : vector<288x64xf32> to vector<32x64xf32>
    %cst_51 = arith.constant dense<0.000000e+00> : vector<4x64xf32>
    %142 = tpu.matmul %140, %141, %cst_51 {dimension_numbers = #tpu.dot_dimension_numbers<[1], [0], [0], [1], [0, 0, 1, 1], [], []>} : vector<4x32xf32>, vector<32x64xf32>, vector<4x64xf32> -> vector<4x64xf32>
    %143 = arith.addf %139, %142 : vector<4x64xf32>
    %144 = vector.extract_strided_slice %113 {offsets = [28, 0], sizes = [4, 32], strides = [1, 1]} : vector<36x32xf32> to vector<4x32xf32>
    %145 = vector.extract_strided_slice %114 {offsets = [224, 0], sizes = [32, 64], strides = [1, 1]} : vector<288x64xf32> to vector<32x64xf32>
    %cst_52 = arith.constant dense<0.000000e+00> : vector<4x64xf32>
    %146 = tpu.matmul %144, %145, %cst_52 {dimension_numbers = #tpu.dot_dimension_numbers<[1], [0], [0], [1], [0, 0, 1, 1], [], []>} : vector<4x32xf32>, vector<32x64xf32>, vector<4x64xf32> -> vector<4x64xf32>
    %147 = arith.addf %143, %146 : vector<4x64xf32>
    %148 = vector.extract_strided_slice %113 {offsets = [32, 0], sizes = [4, 32], strides = [1, 1]} : vector<36x32xf32> to vector<4x32xf32>
    %149 = vector.extract_strided_slice %114 {offsets = [256, 0], sizes = [32, 64], strides = [1, 1]} : vector<288x64xf32> to vector<32x64xf32>
    %cst_53 = arith.constant dense<0.000000e+00> : vector<4x64xf32>
    %150 = tpu.matmul %148, %149, %cst_53 {dimension_numbers = #tpu.dot_dimension_numbers<[1], [0], [0], [1], [0, 0, 1, 1], [], []>} : vector<4x32xf32>, vector<32x64xf32>, vector<4x64xf32> -> vector<4x64xf32>
    %151 = arith.addf %147, %150 : vector<4x64xf32>
    %c0_54 = arith.constant 0 : index
    %c0_55 = arith.constant 0 : index
    %152 = vector.load %arg10[%c0_54, %c0_55] : memref<3x64xf32, #tpu.memory_space<vmem>>, vector<3x64xf32>
    %153 = vector.extract_strided_slice %152 {offsets = [0, 0], sizes = [1, 64], strides = [1, 1]} : vector<3x64xf32> to vector<1x64xf32>
    %154 = vector.broadcast %153 : vector<1x64xf32> to vector<4x64xf32>
    %155 = arith.addf %151, %154 : vector<4x64xf32>
    %cst_56 = arith.constant 0.000000e+00 : f32
    %156 = vector.broadcast %cst_56 : f32 to vector<4x64xf32>
    %157 = arith.cmpf oge, %155, %156 : vector<4x64xf32>
    %cst_57 = arith.constant 2.000000e-01 : f32
    %158 = vector.broadcast %cst_57 : f32 to vector<4x64xf32>
    %159 = arith.mulf %158, %155 : vector<4x64xf32>
    %160 = arith.select %157, %155, %159 : vector<4x64xi1>, vector<4x64xf32>
    %161 = vector.extract_strided_slice %152 {offsets = [1, 0], sizes = [1, 64], strides = [1, 1]} : vector<3x64xf32> to vector<1x64xf32>
    %162 = vector.broadcast %161 : vector<1x64xf32> to vector<4x64xf32>
    %163 = arith.mulf %160, %162 : vector<4x64xf32>
    %164 = vector.extract_strided_slice %152 {offsets = [2, 0], sizes = [1, 64], strides = [1, 1]} : vector<3x64xf32> to vector<1x64xf32>
    %165 = vector.broadcast %164 : vector<1x64xf32> to vector<4x64xf32>
    %166 = arith.addf %163, %165 : vector<4x64xf32>
    %c0_58 = arith.constant 0 : index
    %c0_59 = arith.constant 0 : index
    %167 = vector.load %arg11[%c0_58, %c0_59] : memref<9x4xf32, #tpu.memory_space<vmem>>, vector<9x4xf32>
    %cst_60 = arith.constant dense<0.000000e+00> : vector<9x64xf32>
    %168 = tpu.matmul %167, %166, %cst_60 {dimension_numbers = #tpu.dot_dimension_numbers<[1], [0], [0], [1], [0, 0, 1, 1], [], []>} : vector<9x4xf32>, vector<4x64xf32>, vector<9x64xf32> -> vector<9x64xf32>
    %c0_61 = arith.constant 0 : index
    %c0_62 = arith.constant 0 : index
    %169 = vector.load %arg12[%c0_61, %c0_62] : memref<576x128xf32, #tpu.memory_space<vmem>>, vector<576x128xf32>
    %cst_63 = arith.constant 0.000000e+00 : f32
    %170 = vector.broadcast %cst_63 : f32 to vector<1x128xf32>
    %171 = vector.extract_strided_slice %168 {offsets = [0, 0], sizes = [1, 64], strides = [1, 1]} : vector<9x64xf32> to vector<1x64xf32>
    %172 = vector.extract_strided_slice %169 {offsets = [0, 0], sizes = [64, 128], strides = [1, 1]} : vector<576x128xf32> to vector<64x128xf32>
    %cst_64 = arith.constant dense<0.000000e+00> : vector<1x128xf32>
    %173 = tpu.matmul %171, %172, %cst_64 {dimension_numbers = #tpu.dot_dimension_numbers<[1], [0], [0], [1], [0, 0, 1, 1], [], []>} : vector<1x64xf32>, vector<64x128xf32>, vector<1x128xf32> -> vector<1x128xf32>
    %174 = arith.addf %170, %173 : vector<1x128xf32>
    %175 = vector.extract_strided_slice %168 {offsets = [1, 0], sizes = [1, 64], strides = [1, 1]} : vector<9x64xf32> to vector<1x64xf32>
    %176 = vector.extract_strided_slice %169 {offsets = [64, 0], sizes = [64, 128], strides = [1, 1]} : vector<576x128xf32> to vector<64x128xf32>
    %cst_65 = arith.constant dense<0.000000e+00> : vector<1x128xf32>
    %177 = tpu.matmul %175, %176, %cst_65 {dimension_numbers = #tpu.dot_dimension_numbers<[1], [0], [0], [1], [0, 0, 1, 1], [], []>} : vector<1x64xf32>, vector<64x128xf32>, vector<1x128xf32> -> vector<1x128xf32>
    %178 = arith.addf %174, %177 : vector<1x128xf32>
    %179 = vector.extract_strided_slice %168 {offsets = [2, 0], sizes = [1, 64], strides = [1, 1]} : vector<9x64xf32> to vector<1x64xf32>
    %180 = vector.extract_strided_slice %169 {offsets = [128, 0], sizes = [64, 128], strides = [1, 1]} : vector<576x128xf32> to vector<64x128xf32>
    %cst_66 = arith.constant dense<0.000000e+00> : vector<1x128xf32>
    %181 = tpu.matmul %179, %180, %cst_66 {dimension_numbers = #tpu.dot_dimension_numbers<[1], [0], [0], [1], [0, 0, 1, 1], [], []>} : vector<1x64xf32>, vector<64x128xf32>, vector<1x128xf32> -> vector<1x128xf32>
    %182 = arith.addf %178, %181 : vector<1x128xf32>
    %183 = vector.extract_strided_slice %168 {offsets = [3, 0], sizes = [1, 64], strides = [1, 1]} : vector<9x64xf32> to vector<1x64xf32>
    %184 = vector.extract_strided_slice %169 {offsets = [192, 0], sizes = [64, 128], strides = [1, 1]} : vector<576x128xf32> to vector<64x128xf32>
    %cst_67 = arith.constant dense<0.000000e+00> : vector<1x128xf32>
    %185 = tpu.matmul %183, %184, %cst_67 {dimension_numbers = #tpu.dot_dimension_numbers<[1], [0], [0], [1], [0, 0, 1, 1], [], []>} : vector<1x64xf32>, vector<64x128xf32>, vector<1x128xf32> -> vector<1x128xf32>
    %186 = arith.addf %182, %185 : vector<1x128xf32>
    %187 = vector.extract_strided_slice %168 {offsets = [4, 0], sizes = [1, 64], strides = [1, 1]} : vector<9x64xf32> to vector<1x64xf32>
    %188 = vector.extract_strided_slice %169 {offsets = [256, 0], sizes = [64, 128], strides = [1, 1]} : vector<576x128xf32> to vector<64x128xf32>
    %cst_68 = arith.constant dense<0.000000e+00> : vector<1x128xf32>
    %189 = tpu.matmul %187, %188, %cst_68 {dimension_numbers = #tpu.dot_dimension_numbers<[1], [0], [0], [1], [0, 0, 1, 1], [], []>} : vector<1x64xf32>, vector<64x128xf32>, vector<1x128xf32> -> vector<1x128xf32>
    %190 = arith.addf %186, %189 : vector<1x128xf32>
    %191 = vector.extract_strided_slice %168 {offsets = [5, 0], sizes = [1, 64], strides = [1, 1]} : vector<9x64xf32> to vector<1x64xf32>
    %192 = vector.extract_strided_slice %169 {offsets = [320, 0], sizes = [64, 128], strides = [1, 1]} : vector<576x128xf32> to vector<64x128xf32>
    %cst_69 = arith.constant dense<0.000000e+00> : vector<1x128xf32>
    %193 = tpu.matmul %191, %192, %cst_69 {dimension_numbers = #tpu.dot_dimension_numbers<[1], [0], [0], [1], [0, 0, 1, 1], [], []>} : vector<1x64xf32>, vector<64x128xf32>, vector<1x128xf32> -> vector<1x128xf32>
    %194 = arith.addf %190, %193 : vector<1x128xf32>
    %195 = vector.extract_strided_slice %168 {offsets = [6, 0], sizes = [1, 64], strides = [1, 1]} : vector<9x64xf32> to vector<1x64xf32>
    %196 = vector.extract_strided_slice %169 {offsets = [384, 0], sizes = [64, 128], strides = [1, 1]} : vector<576x128xf32> to vector<64x128xf32>
    %cst_70 = arith.constant dense<0.000000e+00> : vector<1x128xf32>
    %197 = tpu.matmul %195, %196, %cst_70 {dimension_numbers = #tpu.dot_dimension_numbers<[1], [0], [0], [1], [0, 0, 1, 1], [], []>} : vector<1x64xf32>, vector<64x128xf32>, vector<1x128xf32> -> vector<1x128xf32>
    %198 = arith.addf %194, %197 : vector<1x128xf32>
    %199 = vector.extract_strided_slice %168 {offsets = [7, 0], sizes = [1, 64], strides = [1, 1]} : vector<9x64xf32> to vector<1x64xf32>
    %200 = vector.extract_strided_slice %169 {offsets = [448, 0], sizes = [64, 128], strides = [1, 1]} : vector<576x128xf32> to vector<64x128xf32>
    %cst_71 = arith.constant dense<0.000000e+00> : vector<1x128xf32>
    %201 = tpu.matmul %199, %200, %cst_71 {dimension_numbers = #tpu.dot_dimension_numbers<[1], [0], [0], [1], [0, 0, 1, 1], [], []>} : vector<1x64xf32>, vector<64x128xf32>, vector<1x128xf32> -> vector<1x128xf32>
    %202 = arith.addf %198, %201 : vector<1x128xf32>
    %203 = vector.extract_strided_slice %168 {offsets = [8, 0], sizes = [1, 64], strides = [1, 1]} : vector<9x64xf32> to vector<1x64xf32>
    %204 = vector.extract_strided_slice %169 {offsets = [512, 0], sizes = [64, 128], strides = [1, 1]} : vector<576x128xf32> to vector<64x128xf32>
    %cst_72 = arith.constant dense<0.000000e+00> : vector<1x128xf32>
    %205 = tpu.matmul %203, %204, %cst_72 {dimension_numbers = #tpu.dot_dimension_numbers<[1], [0], [0], [1], [0, 0, 1, 1], [], []>} : vector<1x64xf32>, vector<64x128xf32>, vector<1x128xf32> -> vector<1x128xf32>
    %206 = arith.addf %202, %205 : vector<1x128xf32>
    %c0_73 = arith.constant 0 : index
    %c0_74 = arith.constant 0 : index
    %207 = vector.load %arg13[%c0_73, %c0_74] : memref<3x128xf32, #tpu.memory_space<vmem>>, vector<3x128xf32>
    %208 = vector.extract_strided_slice %207 {offsets = [0, 0], sizes = [1, 128], strides = [1, 1]} : vector<3x128xf32> to vector<1x128xf32>
    %209 = arith.addf %206, %208 : vector<1x128xf32>
    %cst_75 = arith.constant 0.000000e+00 : f32
    %210 = vector.broadcast %cst_75 : f32 to vector<1x128xf32>
    %211 = arith.cmpf oge, %209, %210 : vector<1x128xf32>
    %cst_76 = arith.constant 2.000000e-01 : f32
    %212 = vector.broadcast %cst_76 : f32 to vector<1x128xf32>
    %213 = arith.mulf %212, %209 : vector<1x128xf32>
    %214 = arith.select %211, %209, %213 : vector<1x128xi1>, vector<1x128xf32>
    %215 = vector.extract_strided_slice %207 {offsets = [1, 0], sizes = [1, 128], strides = [1, 1]} : vector<3x128xf32> to vector<1x128xf32>
    %216 = arith.mulf %214, %215 : vector<1x128xf32>
    %217 = vector.extract_strided_slice %207 {offsets = [2, 0], sizes = [1, 128], strides = [1, 1]} : vector<3x128xf32> to vector<1x128xf32>
    %218 = arith.addf %216, %217 : vector<1x128xf32>
    %c0_77 = arith.constant 0 : index
    %c0_78 = arith.constant 0 : index
    %219 = vector.load %arg14[%c0_77, %c0_78] : memref<1x128xf32, #tpu.memory_space<vmem>>, vector<1x128xf32>
    %220 = arith.mulf %218, %219 : vector<1x128xf32>
    %cst_79 = arith.constant dense<0.000000e+00> : vector<1xf32>
    %221 = vector.multi_reduction <add>, %220, %cst_79 [1] : vector<1x128xf32> to vector<1xf32>
    %222 = vector.shape_cast %221 : vector<1xf32> to vector<1x1xf32>
    %cst_80 = arith.constant dense<0.000000e+00> : vector<1xf32>
    %223 = vector.multi_reduction <add>, %222, %cst_80 [0] : vector<1x1xf32> to vector<1xf32>
    %224 = vector.shape_cast %223 : vector<1xf32> to vector<1x1xf32>
    %c0_81 = arith.constant 0 : index
    %c0_82 = arith.constant 0 : index
    %225 = vector.load %arg15[%c0_81, %c0_82] : memref<1x1xf32, #tpu.memory_space<vmem>>, vector<1x1xf32>
    %226 = arith.addf %224, %225 : vector<1x1xf32>
    %cst_83 = arith.constant 0.000000e+00 : f32
    %227 = vector.broadcast %cst_83 : f32 to vector<1x1xf32>
    %228 = arith.subf %227, %226 : vector<1x1xf32>
    %229 = math.exp %228 : vector<1x1xf32>
    %cst_84 = arith.constant 1.000000e+00 : f32
    %230 = vector.broadcast %cst_84 : f32 to vector<1x1xf32>
    %231 = arith.addf %230, %229 : vector<1x1xf32>
    %cst_85 = arith.constant 1.000000e+00 : f32
    %232 = vector.broadcast %cst_85 : f32 to vector<1x1xf32>
    %233 = arith.divf %232, %231 : vector<1x1xf32>
    %234 = vector.shape_cast %233 : vector<1x1xf32> to vector<1x1x1xf32>
    %c0_86 = arith.constant 0 : index
    %c0_87 = arith.constant 0 : index
    %c0_88 = arith.constant 0 : index
    %235 = vector.load %arg16[%c0_86, %c0_87, %c0_88] : memref<1x1x1xf32, #tpu.memory_space<vmem>>, vector<1x1x1xf32>
    tpu.vector_store %arg16[%c0_86, %c0_87, %c0_88], %234 {strides = array<i32>} : memref<1x1x1xf32, #tpu.memory_space<vmem>>, vector<1x1x1xf32>,
    return
  }
  func.func @transform_0(%arg0: i32) -> (i32, i32, i32) {
    %c0_i32 = arith.constant 0 : i32
    %c0_i32_0 = arith.constant 0 : i32
    %c0_i32_1 = arith.constant 0 : i32
    return %arg0, %c0_i32, %c0_i32_0 : i32, i32, i32
  }
  func.func @transform_1(%arg0: i32) -> (i32, i32) {
    %c0_i32 = arith.constant 0 : i32
    %c0_i32_0 = arith.constant 0 : i32
    %c0_i32_1 = arith.constant 0 : i32
    return %c0_i32, %c0_i32_0 : i32, i32
  }
  func.func @transform_2(%arg0: i32) -> (i32, i32) {
    %c0_i32 = arith.constant 0 : i32
    %c0_i32_0 = arith.constant 0 : i32
    %c0_i32_1 = arith.constant 0 : i32
    return %c0_i32, %c0_i32_0 : i32, i32
  }
  func.func @transform_3(%arg0: i32) -> (i32, i32) {
    %c0_i32 = arith.constant 0 : i32
    %c0_i32_0 = arith.constant 0 : i32
    %c0_i32_1 = arith.constant 0 : i32
    return %c0_i32, %c0_i32_0 : i32, i32
  }
  func.func @transform_4(%arg0: i32) -> (i32, i32) {
    %c0_i32 = arith.constant 0 : i32
    %c0_i32_0 = arith.constant 0 : i32
    %c0_i32_1 = arith.constant 0 : i32
    return %c0_i32, %c0_i32_0 : i32, i32
  }
  func.func @transform_5(%arg0: i32) -> (i32, i32) {
    %c0_i32 = arith.constant 0 : i32
    %c0_i32_0 = arith.constant 0 : i32
    %c0_i32_1 = arith.constant 0 : i32
    return %c0_i32, %c0_i32_0 : i32, i32
  }
  func.func @transform_6(%arg0: i32) -> (i32, i32) {
    %c0_i32 = arith.constant 0 : i32
    %c0_i32_0 = arith.constant 0 : i32
    %c0_i32_1 = arith.constant 0 : i32
    return %c0_i32, %c0_i32_0 : i32, i32
  }
  func.func @transform_7(%arg0: i32) -> (i32, i32) {
    %c0_i32 = arith.constant 0 : i32
    %c0_i32_0 = arith.constant 0 : i32
    %c0_i32_1 = arith.constant 0 : i32
    return %c0_i32, %c0_i32_0 : i32, i32
  }
  func.func @transform_8(%arg0: i32) -> (i32, i32) {
    %c0_i32 = arith.constant 0 : i32
    %c0_i32_0 = arith.constant 0 : i32
    %c0_i32_1 = arith.constant 0 : i32
    return %c0_i32, %c0_i32_0 : i32, i32
  }
  func.func @transform_9(%arg0: i32) -> (i32, i32) {
    %c0_i32 = arith.constant 0 : i32
    %c0_i32_0 = arith.constant 0 : i32
    %c0_i32_1 = arith.constant 0 : i32
    return %c0_i32, %c0_i32_0 : i32, i32
  }
  func.func @transform_10(%arg0: i32) -> (i32, i32) {
    %c0_i32 = arith.constant 0 : i32
    %c0_i32_0 = arith.constant 0 : i32
    %c0_i32_1 = arith.constant 0 : i32
    return %c0_i32, %c0_i32_0 : i32, i32
  }
  func.func @transform_11(%arg0: i32) -> (i32, i32) {
    %c0_i32 = arith.constant 0 : i32
    %c0_i32_0 = arith.constant 0 : i32
    %c0_i32_1 = arith.constant 0 : i32
    return %c0_i32, %c0_i32_0 : i32, i32
  }
  func.func @transform_12(%arg0: i32) -> (i32, i32) {
    %c0_i32 = arith.constant 0 : i32
    %c0_i32_0 = arith.constant 0 : i32
    %c0_i32_1 = arith.constant 0 : i32
    return %c0_i32, %c0_i32_0 : i32, i32
  }
  func.func @transform_13(%arg0: i32) -> (i32, i32) {
    %c0_i32 = arith.constant 0 : i32
    %c0_i32_0 = arith.constant 0 : i32
    %c0_i32_1 = arith.constant 0 : i32
    return %c0_i32, %c0_i32_0 : i32, i32
  }
  func.func @transform_14(%arg0: i32) -> (i32, i32) {
    %c0_i32 = arith.constant 0 : i32
    %c0_i32_0 = arith.constant 0 : i32
    %c0_i32_1 = arith.constant 0 : i32
    return %c0_i32, %c0_i32_0 : i32, i32
  }
  func.func @transform_15(%arg0: i32) -> (i32, i32, i32) {
    %c0_i32 = arith.constant 0 : i32
    %c0_i32_0 = arith.constant 0 : i32
    %c0_i32_1 = arith.constant 0 : i32
    return %arg0, %c0_i32, %c0_i32_0 : i32, i32, i32
  }
}

</mosaic_0001>

<bundles_post_ra>
// kernel: cgan_discriminator_forward.1
= control target key start
LH: loop header
LB: loop body
LE: loop exit
PB: predicated region body
PF: predicated region fallthrough
CT: control target
= control target key end

     0   :  { %s6561_s20 = smov 0   ;;  %s7870_s0 = inlined_call_operand.vmem [shape: f32[2,256,4], index: 0, kind: input, shape index: {}]   ;;  %s7871_s1 = inlined_call_operand.vmem [shape: f32[576,256], index: 1, kind: input, shape index: {}]   ;;  %s7872_s2 = inlined_call_operand.vmem [shape: f32[36,16], index: 2, kind: input, shape index: {}]   ;;  %s7873_s3 = inlined_call_operand.vmem [shape: f32[3,16], index: 3, kind: input, shape index: {}]   ;;  %s7874_s4 = inlined_call_operand.vmem [shape: f32[144,64], index: 4, kind: input, shape index: {}]   ;;  %s7875_s5 = inlined_call_operand.vmem [shape: f32[144,32], index: 5, kind: input, shape index: {}]   ;;  %s7876_s6 = inlined_call_operand.vmem [shape: f32[3,32], index: 6, kind: input, shape index: {}]   ;;  %s7877_s7 = inlined_call_operand.vmem [shape: f32[36,16], index: 7, kind: input, shape index: {}]   ;;  %s7878_s8 = inlined_call_operand.vmem [shape: f32[288,64], index: 8, kind: input, shape index: {}]   ;;  %s7879_s9 = inlined_call_operand.vmem [shape: f32[3,64], index: 9, kind: input, shape index: {}]   ;;  %s7880_s10 = inlined_call_operand.vmem [shape: f32[9,4], index: 10, kind: input, shape index: {}]   ;;  %s7881_s11 = inlined_call_operand.vmem [shape: f32[576,128], index: 11, kind: input, shape index: {}]   ;;  %s7882_s12 = inlined_call_operand.vmem [shape: f32[3,128], index: 12, kind: input, shape index: {}]   ;;  %s7883_s13 = inlined_call_operand.vmem [shape: f32[1,128], index: 13, kind: input, shape index: {}]   ;;  %s7884_s14 = inlined_call_operand.<no memory space> [shape: f32[1,1], index: 14, kind: input, shape index: {}]   ;;  %s7885_s15 = inlined_call_operand.vmem [shape: f32[2,1,1], index: 15, kind: output, shape index: {}]  }
   0x1   :  { %v20_v0 = vstv %s7884_s14 }
   0x2   :  { %21 = vst [vmem:[#allocation2] sm:$0x1] %v20_v0 }
   0x3 LB: > { %s5149_s21 = sadd.s32 4294967295, %s6473_s20   ;;  %p5153_p0 = scmp.ge.s32.totalorder %s6473_s20, 1  ;;  %s6473_s20 = sphi %s6561_s20, %s27_s20  }
   0x4   : > { %p439_p1 = scmp.lt.s32.totalorder %s6473_s20, 3 }
   0x6   : > { %p440_p2 = pnand %p5153_p0, %p439_p1 }
   0x7   : > { %p485_p3 = scmp.lt.s32.totalorder (!%p440_p2), %s5149_s21, 1  ;;  %v526_v1 = vld [vmem:[%s7871_s1 + $0x8] sm:$0xff] (!%p440_p2)  ;;  %v6475_v2 = vmov (!%p440_p2), 0.0|0.0   ;;  %v525_v51 = vld [vmem:[%s7871_s1] sm:$0xff] (!%p440_p2)  ;;  %v528_v52 = vld [vmem:[%s7871_s1 + $0x18] sm:$0xff] (!%p440_p2)  ;;  %vm1126_vm0 = vcmask (!%p440_p2), 1043456  }
   0x8   : > { %443 = sbr.rel (%p440_p2) target bundleno = 2500 (0x9c4), region = 80  ;;  %6107 = vmatprep.subr.bf16.mxu0 (!%p440_p2), %v6475_v2  ;;  %733 = vmatprep.mubr.f32.mxu0 (!%p440_p2), %v526_v1  ;;  %v527_v53 = vld [vmem:[%s7871_s1 + $0x10] sm:$0xff] (!%p440_p2)  ;;  %v530_v54 = vld [vmem:[%s7871_s1 + $0x28] sm:$0xff] (!%p440_p2)  ;;  %v529_v55 = vld [vmem:[%s7871_s1 + $0x20] sm:$0xff] (!%p440_p2)  ;;  %vm1101_vm1 = vcmask (!%p440_p2), 31744   ;;  %vm2424_vm2 = vcmask (!%p440_p2), 523264  }
   0x9   : > { %v532_v56 = vld [vmem:[%s7871_s1 + $0x38] sm:$0xff] (!%p440_p2)  ;;  %v531_v57 = vld [vmem:[%s7871_s1 + $0x30] sm:$0xff] (!%p440_p2)  ;;  %v534_v58 = vld [vmem:[%s7871_s1 + $0x48] sm:$0xff] (!%p440_p2)  ;;  %vm2652_vm11 = vcmask (!%p440_p2), 130048   ;;  %vm6476_vm12 = vmmov (!%p440_p2), 0   ;;  %vm3569_vm15 = vcmask (!%p440_p2), 261120  }
   0xa   : > { %v533_v59 = vld [vmem:[%s7871_s1 + $0x40] sm:$0xff] (!%p440_p2)  ;;  %v536_v60 = vld [vmem:[%s7871_s1 + $0x58] sm:$0xff] (!%p440_p2)  ;;  %v535_v61 = vld [vmem:[%s7871_s1 + $0x50] sm:$0xff] (!%p440_p2) }
   0xb   : > { %v538_v62 = vld [vmem:[%s7871_s1 + $0x68] sm:$0xff] (!%p440_p2)  ;;  %v537_v63 = vld [vmem:[%s7871_s1 + $0x60] sm:$0xff] (!%p440_p2)  ;;  %v540_v0 = vld [vmem:[%s7871_s1 + $0x78] sm:$0xff] (!%p440_p2) }
   0xc   : > { %v539_v1 = vld [vmem:[%s7871_s1 + $0x70] sm:$0xff] (!%p440_p2) }
   0xf   : > { %s7887_s21 = smov (!%p485_p3, %s5149_s21), 1 }
  0x10   : > { %s5301_s14 = sshll.u32 %s7887_s21, 8  ;;  %s492_s22 = scalar_lea.vmem %s7885_s15, %s7887_s21 }
  0x11   : > { %s6579_s26 = scalar_lea.vmem %s7870_s0, %s5301_s14 }
  0x12   : > { %v493_v3 = vld [vmem:[%s6579_s26] sm:$0xff]  ;;  %v494_v4 = vld [vmem:[%s6579_s26 + $0x8] sm:$0xff]  ;;  %v495_v5 = vld [vmem:[%s6579_s26 + $0x10] sm:$0xff] }
  0x13   : > { %v6108_v6 = vpack.c.bf16 %v494_v4, %v493_v3  ;;  %v496_v7 = vld [vmem:[%s6579_s26 + $0x18] sm:$0xff]  ;;  %v497_v9 = vld [vmem:[%s6579_s26 + $0x20] sm:$0xff]  ;;  %v498_v10 = vld [vmem:[%s6579_s26 + $0x28] sm:$0xff] }
  0x14   : > { %v6111_v8 = vpack.c.bf16 %v496_v7, %v495_v5  ;;  %v6114_v11 = vpack.c.bf16 %v498_v10, %v497_v9  ;;  %v499_v12 = vld [vmem:[%s6579_s26 + $0x30] sm:$0xff]  ;;  %v500_v13 = vld [vmem:[%s6579_s26 + $0x38] sm:$0xff]  ;;  %v501_v15 = vld [vmem:[%s6579_s26 + $0x40] sm:$0xff] }
  0x15   : > { %6109 = vmatpush1.bf16.msra.mxu0 %v6108_v6  ;;  %v6117_v14 = vpack.c.bf16 %v500_v13, %v499_v12  ;;  %v502_v16 = vld [vmem:[%s6579_s26 + $0x48] sm:$0xff]  ;;  %v503_v18 = vld [vmem:[%s6579_s26 + $0x50] sm:$0xff]  ;;  %v504_v19 = vld [vmem:[%s6579_s26 + $0x58] sm:$0xff] }
  0x16   : > { %6110 = vmatprep.subr.bf16.mxu0 %v6475_v2  ;;  %v6120_v17 = vpack.c.bf16 %v502_v16, %v501_v15  ;;  %v6123_v20 = vpack.c.bf16 %v504_v19, %v503_v18  ;;  %v505_v21 = vld [vmem:[%s6579_s26 + $0x60] sm:$0xff]  ;;  %v506_v22 = vld [vmem:[%s6579_s26 + $0x68] sm:$0xff]  ;;  %v507_v24 = vld [vmem:[%s6579_s26 + $0x70] sm:$0xff] }
  0x17   : > { %v6126_v23 = vpack.c.bf16 %v506_v22, %v505_v21  ;;  %v508_v25 = vld [vmem:[%s6579_s26 + $0x78] sm:$0xff]  ;;  %v509_v27 = vld [vmem:[%s6579_s26 + $0x80] sm:$0xff]  ;;  %v510_v28 = vld [vmem:[%s6579_s26 + $0x88] sm:$0xff] }
  0x18   : > { %v6129_v26 = vpack.c.bf16 %v508_v25, %v507_v24  ;;  %v6132_v29 = vpack.c.bf16 %v510_v28, %v509_v27  ;;  %v511_v30 = vld [vmem:[%s6579_s26 + $0x90] sm:$0xff]  ;;  %v512_v31 = vld [vmem:[%s6579_s26 + $0x98] sm:$0xff]  ;;  %v513_v33 = vld [vmem:[%s6579_s26 + $0xa0] sm:$0xff] }
  0x19   : > { %6112 = vmatpush1.bf16.msra.mxu0 %v6111_v8  ;;  %v6135_v32 = vpack.c.bf16 %v512_v31, %v511_v30  ;;  %v514_v34 = vld [vmem:[%s6579_s26 + $0xa8] sm:$0xff]  ;;  %v515_v36 = vld [vmem:[%s6579_s26 + $0xb0] sm:$0xff]  ;;  %v516_v37 = vld [vmem:[%s6579_s26 + $0xb8] sm:$0xff] }
  0x1a   : > { %6113 = vmatprep.subr.bf16.mxu0 %v6475_v2  ;;  %v6138_v35 = vpack.c.bf16 %v514_v34, %v513_v33  ;;  %v6141_v38 = vpack.c.bf16 %v516_v37, %v515_v36  ;;  %v517_v39 = vld [vmem:[%s6579_s26 + $0xc0] sm:$0xff]  ;;  %v518_v40 = vld [vmem:[%s6579_s26 + $0xc8] sm:$0xff]  ;;  %v519_v42 = vld [vmem:[%s6579_s26 + $0xd0] sm:$0xff] }
  0x1b   : > { %v6144_v41 = vpack.c.bf16 %v518_v40, %v517_v39  ;;  %v520_v43 = vld [vmem:[%s6579_s26 + $0xd8] sm:$0xff]  ;;  %v521_v45 = vld [vmem:[%s6579_s26 + $0xe0] sm:$0xff]  ;;  %v522_v46 = vld [vmem:[%s6579_s26 + $0xe8] sm:$0xff] }
  0x1c   : > { %v6147_v44 = vpack.c.bf16 %v520_v43, %v519_v42  ;;  %v6150_v47 = vpack.c.bf16 %v522_v46, %v521_v45  ;;  %v523_v48 = vld [vmem:[%s6579_s26 + $0xf0] sm:$0xff]  ;;  %v524_v49 = vld [vmem:[%s6579_s26 + $0xf8] sm:$0xff]  ;;  %v542_v3 = vld [vmem:[%s7871_s1 + $0x88] sm:$0xff] }
  0x1d   : > { %6115 = vmatpush1.bf16.msra.mxu0 %v6114_v11  ;;  %v6153_v50 = vpack.c.bf16 %v524_v49, %v523_v48  ;;  %v541_v4 = vld [vmem:[%s7871_s1 + $0x80] sm:$0xff]  ;;  %v544_v5 = vld [vmem:[%s7871_s1 + $0x98] sm:$0xff]  ;;  %v543_v6 = vld [vmem:[%s7871_s1 + $0x90] sm:$0xff] }
  0x1e   : > { %6116 = vmatprep.subr.bf16.mxu0 %v6475_v2  ;;  %v546_v7 = vld [vmem:[%s7871_s1 + $0xa8] sm:$0xff]  ;;  %v545_v8 = vld [vmem:[%s7871_s1 + $0xa0] sm:$0xff]  ;;  %v548_v9 = vld [vmem:[%s7871_s1 + $0xb8] sm:$0xff] }
  0x1f   : > { %v547_v10 = vld [vmem:[%s7871_s1 + $0xb0] sm:$0xff]  ;;  %v550_v11 = vld [vmem:[%s7871_s1 + $0xc8] sm:$0xff]  ;;  %v549_v12 = vld [vmem:[%s7871_s1 + $0xc0] sm:$0xff] }
  0x20   : > { %v552_v13 = vld [vmem:[%s7871_s1 + $0xd8] sm:$0xff]  ;;  %v554_v15 = vld [vmem:[%s7871_s1 + $0xe8] sm:$0xff]  ;;  %v553_v16 = vld [vmem:[%s7871_s1 + $0xe0] sm:$0xff] }
  0x21   : > { %6118 = vmatpush1.bf16.msra.mxu0 %v6117_v14  ;;  %v551_v14 = vld [vmem:[%s7871_s1 + $0xd0] sm:$0xff]  ;;  %v558_v19 = vld [vmem:[%s7871_s1 + $0x108] sm:$0xff]  ;;  %v560_v21 = vld [vmem:[%s7871_s1 + $0x118] sm:$0xff] }
  0x22   : > { %6119 = vmatprep.subr.bf16.mxu0 %v6475_v2  ;;  %v555_v18 = vld [vmem:[%s7871_s1 + $0xf0] sm:$0xff]  ;;  %v561_v24 = vld [vmem:[%s7871_s1 + $0x120] sm:$0xff]  ;;  %v564_v25 = vld [vmem:[%s7871_s1 + $0x138] sm:$0xff] }
  0x23   : > { %v559_v22 = vld [vmem:[%s7871_s1 + $0x110] sm:$0xff]  ;;  %v566_v27 = vld [vmem:[%s7871_s1 + $0x148] sm:$0xff]  ;;  %v565_v28 = vld [vmem:[%s7871_s1 + $0x140] sm:$0xff] }
  0x24   : > { %v567_v30 = vld [vmem:[%s7871_s1 + $0x150] sm:$0xff]  ;;  %v570_v31 = vld [vmem:[%s7871_s1 + $0x168] sm:$0xff]  ;;  %v572_v33 = vld [vmem:[%s7871_s1 + $0x178] sm:$0xff] }
  0x25   : > { %6121 = vmatpush1.bf16.msra.mxu0 %v6120_v17  ;;  %v556_v17 = vld [vmem:[%s7871_s1 + $0xf8] sm:$0xff]  ;;  %v571_v34 = vld [vmem:[%s7871_s1 + $0x170] sm:$0xff]  ;;  %v573_v36 = vld [vmem:[%s7871_s1 + $0x180] sm:$0xff] }
  0x26   : > { %6122 = vmatprep.subr.bf16.mxu0 %v6475_v2  ;;  %v576_v37 = vld [vmem:[%s7871_s1 + $0x198] sm:$0xff]  ;;  %v578_v39 = vld [vmem:[%s7871_s1 + $0x1a8] sm:$0xff]  ;;  %v577_v40 = vld [vmem:[%s7871_s1 + $0x1a0] sm:$0xff] }
  0x27   : > { %v579_v42 = vld [vmem:[%s7871_s1 + $0x1b0] sm:$0xff]  ;;  %v582_v43 = vld [vmem:[%s7871_s1 + $0x1c8] sm:$0xff]  ;;  %v584_v45 = vld [vmem:[%s7871_s1 + $0x1d8] sm:$0xff] }
  0x28   : > { %v583_v46 = vld [vmem:[%s7871_s1 + $0x1d0] sm:$0xff]  ;;  %v6812_v48 = vld [vmem:[%s7872_s2] sm:$0xff] }
  0x29   : > { %6124 = vmatpush1.bf16.msra.mxu0 %v6123_v20  ;;  %v557_v20 = vld [vmem:[%s7871_s1 + $0x100] sm:$0xff]  ;;  %v1100_v49 = vrot.slane %v6812_v48, 4 }
  0x2a   : > { %6125 = vmatprep.subr.bf16.mxu0 %v6475_v2 }
  0x2b   : > { %5581 = vmatprep.subr.msk.mxu1 %vm1126_vm0, %v1100_v49 }
  0x2c   : > { %5582 = vmatpush3.msk.msra.mxu1 %vm1126_vm0, %v1100_v49 }
  0x2d   : > { %6127 = vmatpush1.bf16.msra.mxu0 %v6126_v23  ;;  %v562_v23 = vld [vmem:[%s7871_s1 + $0x128] sm:$0xff]  ;;  %5595 = vmatprep.subr.msk.mxu1 %vm1126_vm0, %v6812_v48 }
  0x2e   : > { %6128 = vmatprep.subr.bf16.mxu0 %v6475_v2 }
  0x31   : > { %6130 = vmatpush1.bf16.msra.mxu0 %v6129_v26  ;;  %v563_v26 = vld [vmem:[%s7871_s1 + $0x130] sm:$0xff] }
  0x32   : > { %6131 = vmatprep.subr.bf16.mxu0 %v6475_v2 }
  0x35   : > { %6133 = vmatpush1.bf16.msra.mxu0 %v6132_v29  ;;  %v568_v29 = vld [vmem:[%s7871_s1 + $0x158] sm:$0xff] }
  0x36   : > { %6134 = vmatprep.subr.bf16.mxu0 %v6475_v2 }
  0x39   : > { %6136 = vmatpush1.bf16.msra.mxu0 %v6135_v32  ;;  %v569_v32 = vld [vmem:[%s7871_s1 + $0x160] sm:$0xff] }
  0x3a   : > { %6137 = vmatprep.subr.bf16.mxu0 %v6475_v2 }
  0x3d   : > { %6139 = vmatpush1.bf16.msra.mxu0 %v6138_v35  ;;  %v574_v35 = vld [vmem:[%s7871_s1 + $0x188] sm:$0xff] }
  0x3e   : > { %6140 = vmatprep.subr.bf16.mxu0 %v6475_v2 }
  0x41   : > { %6142 = vmatpush1.bf16.msra.mxu0 %v6141_v38  ;;  %v575_v38 = vld [vmem:[%s7871_s1 + $0x190] sm:$0xff] }
  0x42   : > { %6143 = vmatprep.subr.bf16.mxu0 %v6475_v2 }
  0x45   : > { %6145 = vmatpush1.bf16.msra.mxu0 %v6144_v41  ;;  %v580_v41 = vld [vmem:[%s7871_s1 + $0x1b8] sm:$0xff] }
  0x46   : > { %6146 = vmatprep.subr.bf16.mxu0 %v6475_v2 }
  0x49   : > { %6148 = vmatpush1.bf16.msra.mxu0 %v6147_v44  ;;  %v581_v44 = vld [vmem:[%s7871_s1 + $0x1c0] sm:$0xff] }
  0x4a   : > { %6149 = vmatprep.subr.bf16.mxu0 %v6475_v2 }
  0x4d   : > { %6151 = vmatpush1.bf16.msra.mxu0 %v6150_v47  ;;  %v586_v47 = vld [vmem:[%s7871_s1 + $0x1e8] sm:$0xff] }
  0x4e   : > { %6152 = vmatprep.subr.bf16.mxu0 %v6475_v2 }
  0x51   : > { %6154 = vmatpush1.bf16.msra.mxu0 %v6153_v50  ;;  %v585_v50 = vld [vmem:[%s7871_s1 + $0x1e0] sm:$0xff] }
  0x52   : > { %6288 = vmatprep.subr.bf16.mxu0 %v6475_v2 }
  0x54   : > { %734 = vmatmul.mubr.f32.vlgmr.msra.gmra.mrb[0].mxu0 %v525_v51  ;;  %v588_v51 = vld [vmem:[%s7871_s1 + $0x1f8] sm:$0xff] }
  0x55   : > { %738 = vmatprep.mubr.f32.mxu0 %v528_v52  ;;  %v587_v52 = vld [vmem:[%s7871_s1 + $0x1f0] sm:$0xff] }
  0x58   : > { %739 = vmatmul.mubr.f32.gmra.mrb[2].mxu0 %v527_v53  ;;  %v590_v53 = vld [vmem:[%s7871_s1 + $0x208] sm:$0xff] }
  0x59   : > { %743 = vmatprep.mubr.f32.mxu0 %v530_v54  ;;  %v589_v54 = vld [vmem:[%s7871_s1 + $0x200] sm:$0xff] }
  0x5c   : > { %744 = vmatmul.mubr.f32.gmra.mrb[4].mxu0 %v529_v55  ;;  %v592_v55 = vld [vmem:[%s7871_s1 + $0x218] sm:$0xff] }
  0x5d   : > { %748 = vmatprep.mubr.f32.mxu0 %v532_v56  ;;  %v591_v56 = vld [vmem:[%s7871_s1 + $0x210] sm:$0xff] }
  0x60   : > { %749 = vmatmul.mubr.f32.gmra.mrb[6].mxu0 %v531_v57  ;;  %v594_v57 = vld [vmem:[%s7871_s1 + $0x228] sm:$0xff] }
  0x61   : > { %753 = vmatprep.mubr.f32.mxu0 %v534_v58  ;;  %v593_v58 = vld [vmem:[%s7871_s1 + $0x220] sm:$0xff] }
  0x64   : > { %754 = vmatmul.mubr.f32.gmra.mrb[8].mxu0 %v533_v59  ;;  %v596_v59 = vld [vmem:[%s7871_s1 + $0x238] sm:$0xff] }
  0x65   : > { %758 = vmatprep.mubr.f32.mxu0 %v536_v60  ;;  %v595_v60 = vld [vmem:[%s7871_s1 + $0x230] sm:$0xff] }
  0x68   : > { %759 = vmatmul.mubr.f32.gmra.mrb[10].mxu0 %v535_v61  ;;  %v598_v61 = vld [vmem:[%s7871_s1 + $0x248] sm:$0xff] }
  0x69   : > { %763 = vmatprep.mubr.f32.mxu0 %v538_v62  ;;  %v597_v62 = vld [vmem:[%s7871_s1 + $0x240] sm:$0xff] }
  0x6c   : > { %764 = vmatmul.mubr.f32.gmra.mrb[12].mxu0 %v537_v63  ;;  %v600_v63 = vld [vmem:[%s7871_s1 + $0x258] sm:$0xff] }
  0x6d   : > { %768 = vmatprep.mubr.f32.mxu0 %v540_v0  ;;  %v599_v0 = vld [vmem:[%s7871_s1 + $0x250] sm:$0xff] }
  0x70   : > { %769 = vmatmul.mubr.f32.gmra.mrb[14].mxu0 %v539_v1  ;;  %v602_v1 = vld [vmem:[%s7871_s1 + $0x268] sm:$0xff] }
  0x71   : > { %773 = vmatprep.mubr.f32.mxu0 %v542_v3  ;;  %v601_v3 = vld [vmem:[%s7871_s1 + $0x260] sm:$0xff] }
  0x74   : > { %774 = vmatmul.mubr.f32.gmra.mrb[16].mxu0 %v541_v4  ;;  %v604_v4 = vld [vmem:[%s7871_s1 + $0x278] sm:$0xff] }
  0x75   : > { %778 = vmatprep.mubr.f32.mxu0 %v544_v5  ;;  %v603_v5 = vld [vmem:[%s7871_s1 + $0x270] sm:$0xff] }
  0x78   : > { %779 = vmatmul.mubr.f32.gmra.mrb[18].mxu0 %v543_v6  ;;  %v606_v6 = vld [vmem:[%s7871_s1 + $0x288] sm:$0xff] }
  0x79   : > { %783 = vmatprep.mubr.f32.mxu0 %v546_v7  ;;  %v605_v7 = vld [vmem:[%s7871_s1 + $0x280] sm:$0xff] }
  0x7c   : > { %784 = vmatmul.mubr.f32.gmra.mrb[20].mxu0 %v545_v8  ;;  %v608_v8 = vld [vmem:[%s7871_s1 + $0x298] sm:$0xff] }
  0x7d   : > { %788 = vmatprep.mubr.f32.mxu0 %v548_v9  ;;  %v607_v9 = vld [vmem:[%s7871_s1 + $0x290] sm:$0xff] }
  0x80   : > { %789 = vmatmul.mubr.f32.gmra.mrb[22].mxu0 %v547_v10  ;;  %v610_v10 = vld [vmem:[%s7871_s1 + $0x2a8] sm:$0xff] }
  0x81   : > { %793 = vmatprep.mubr.f32.mxu0 %v550_v11  ;;  %v609_v11 = vld [vmem:[%s7871_s1 + $0x2a0] sm:$0xff] }
  0x84   : > { %794 = vmatmul.mubr.f32.gmra.mrb[24].mxu0 %v549_v12  ;;  %v612_v12 = vld [vmem:[%s7871_s1 + $0x2b8] sm:$0xff] }
  0x85   : > { %798 = vmatprep.mubr.f32.mxu0 %v552_v13  ;;  %v611_v13 = vld [vmem:[%s7871_s1 + $0x2b0] sm:$0xff] }
  0x88   : > { %799 = vmatmul.mubr.f32.gmra.mrb[26].mxu0 %v551_v14  ;;  %v614_v14 = vld [vmem:[%s7871_s1 + $0x2c8] sm:$0xff] }
  0x89   : > { %803 = vmatprep.mubr.f32.mxu0 %v554_v15  ;;  %v613_v15 = vld [vmem:[%s7871_s1 + $0x2c0] sm:$0xff] }
  0x8c   : > { %804 = vmatmul.mubr.f32.gmra.mrb[28].mxu0 %v553_v16  ;;  %v616_v16 = vld [vmem:[%s7871_s1 + $0x2d8] sm:$0xff] }
  0x8d   : > { %808 = vmatprep.mubr.f32.mxu0 %v556_v17  ;;  %v615_v17 = vld [vmem:[%s7871_s1 + $0x2d0] sm:$0xff] }
  0x90   : > { %809 = vmatmul.mubr.f32.gmra.mrb[30].mxu0 %v555_v18  ;;  %v618_v18 = vld [vmem:[%s7871_s1 + $0x2e8] sm:$0xff] }
  0x91   : > { %813 = vmatprep.mubr.f32.mxu0 %v558_v19  ;;  %v617_v19 = vld [vmem:[%s7871_s1 + $0x2e0] sm:$0xff] }
  0x94   : > { %814 = vmatmul.mubr.f32.gmra.mrb[32].mxu0 %v557_v20  ;;  %v620_v20 = vld [vmem:[%s7871_s1 + $0x2f8] sm:$0xff] }
  0x95   : > { %818 = vmatprep.mubr.f32.mxu0 %v560_v21  ;;  %v619_v21 = vld [vmem:[%s7871_s1 + $0x2f0] sm:$0xff] }
  0x98   : > { %819 = vmatmul.mubr.f32.gmra.mrb[34].mxu0 %v559_v22  ;;  %v622_v22 = vld [vmem:[%s7871_s1 + $0x308] sm:$0xff] }
  0x99   : > { %823 = vmatprep.mubr.f32.mxu0 %v562_v23  ;;  %v621_v23 = vld [vmem:[%s7871_s1 + $0x300] sm:$0xff] }
  0x9c   : > { %824 = vmatmul.mubr.f32.gmra.mrb[36].mxu0 %v561_v24  ;;  %v624_v24 = vld [vmem:[%s7871_s1 + $0x318] sm:$0xff] }
  0x9d   : > { %828 = vmatprep.mubr.f32.mxu0 %v564_v25  ;;  %v623_v25 = vld [vmem:[%s7871_s1 + $0x310] sm:$0xff] }
  0xa0   : > { %829 = vmatmul.mubr.f32.gmra.mrb[38].mxu0 %v563_v26  ;;  %v626_v26 = vld [vmem:[%s7871_s1 + $0x328] sm:$0xff] }
  0xa1   : > { %833 = vmatprep.mubr.f32.mxu0 %v566_v27  ;;  %v625_v27 = vld [vmem:[%s7871_s1 + $0x320] sm:$0xff] }
  0xa4   : > { %834 = vmatmul.mubr.f32.gmra.mrb[40].mxu0 %v565_v28  ;;  %v628_v28 = vld [vmem:[%s7871_s1 + $0x338] sm:$0xff] }
  0xa5   : > { %838 = vmatprep.mubr.f32.mxu0 %v568_v29  ;;  %v627_v29 = vld [vmem:[%s7871_s1 + $0x330] sm:$0xff] }
  0xa8   : > { %839 = vmatmul.mubr.f32.gmra.mrb[42].mxu0 %v567_v30  ;;  %v630_v30 = vld [vmem:[%s7871_s1 + $0x348] sm:$0xff] }
  0xa9   : > { %843 = vmatprep.mubr.f32.mxu0 %v570_v31  ;;  %v629_v31 = vld [vmem:[%s7871_s1 + $0x340] sm:$0xff] }
  0xac   : > { %844 = vmatmul.mubr.f32.gmra.mrb[44].mxu0 %v569_v32  ;;  %v632_v32 = vld [vmem:[%s7871_s1 + $0x358] sm:$0xff] }
  0xad   : > { %848 = vmatprep.mubr.f32.mxu0 %v572_v33  ;;  %v631_v33 = vld [vmem:[%s7871_s1 + $0x350] sm:$0xff] }
  0xb0   : > { %849 = vmatmul.mubr.f32.gmra.mrb[46].mxu0 %v571_v34  ;;  %v634_v34 = vld [vmem:[%s7871_s1 + $0x368] sm:$0xff] }
  0xb1   : > { %853 = vmatprep.mubr.f32.mxu0 %v574_v35 }
  0xb4   : > { %854 = vmatmul.mubr.f32.gmra.mrb[48].mxu0 %v573_v36 }
  0xb5   : > { %858 = vmatprep.mubr.f32.mxu0 %v576_v37  ;;  %v633_v37 = vld [vmem:[%s7871_s1 + $0x360] sm:$0xff] }
  0xb8   : > { %859 = vmatmul.mubr.f32.gmra.mrb[50].mxu0 %v575_v38  ;;  %v636_v38 = vld [vmem:[%s7871_s1 + $0x378] sm:$0xff] }
  0xb9   : > { %863 = vmatprep.mubr.f32.mxu0 %v578_v39 }
  0xbc   : > { %864 = vmatmul.mubr.f32.gmra.mrb[52].mxu0 %v577_v40 }
  0xbd   : > { %868 = vmatprep.mubr.f32.mxu0 %v580_v41  ;;  %v635_v41 = vld [vmem:[%s7871_s1 + $0x370] sm:$0xff] }
  0xc0   : > { %869 = vmatmul.mubr.f32.gmra.mrb[54].mxu0 %v579_v42  ;;  %v638_v42 = vld [vmem:[%s7871_s1 + $0x388] sm:$0xff] }
  0xc1   : > { %873 = vmatprep.mubr.f32.mxu0 %v582_v43 }
  0xc4   : > { %874 = vmatmul.mubr.f32.gmra.mrb[56].mxu0 %v581_v44 }
  0xc5   : > { %878 = vmatprep.mubr.f32.mxu0 %v584_v45  ;;  %v637_v45 = vld [vmem:[%s7871_s1 + $0x380] sm:$0xff] }
  0xc8   : > { %879 = vmatmul.mubr.f32.gmra.mrb[58].mxu0 %v583_v46  ;;  %v640_v46 = vld [vmem:[%s7871_s1 + $0x398] sm:$0xff] }
  0xc9   : > { %883 = vmatprep.mubr.f32.mxu0 %v586_v47 }
  0xcc   : > { %884 = vmatmul.mubr.f32.gmra.mrb[60].mxu0 %v585_v50  ;;  %v639_v50 = vld [vmem:[%s7871_s1 + $0x390] sm:$0xff] }
  0xcd   : > { %888 = vmatprep.mubr.f32.mxu0 %v588_v51  ;;  %v642_v51 = vld [vmem:[%s7871_s1 + $0x3a8] sm:$0xff] }
  0xd0   : > { %889 = vmatmul.mubr.f32.gmra.mrb[62].mxu0 %v587_v52 }
  0xd1   : > { %893 = vmatprep.mubr.f32.mxu0 %v590_v53 }
  0xd4   : > { %894 = vmatmul.mubr.f32.gmra.mrb[64].mxu0 %v589_v54  ;;  %v641_v54 = vld [vmem:[%s7871_s1 + $0x3a0] sm:$0xff] }
  0xd5   : > { %898 = vmatprep.mubr.f32.mxu0 %v592_v55  ;;  %v644_v55 = vld [vmem:[%s7871_s1 + $0x3b8] sm:$0xff] }
  0xd8   : > { %899 = vmatmul.mubr.f32.gmra.mrb[66].mxu0 %v591_v56 }
  0xd9   : > { %903 = vmatprep.mubr.f32.mxu0 %v594_v57 }
  0xdc   : > { %904 = vmatmul.mubr.f32.gmra.mrb[68].mxu0 %v593_v58  ;;  %v643_v58 = vld [vmem:[%s7871_s1 + $0x3b0] sm:$0xff] }
  0xdd   : > { %908 = vmatprep.mubr.f32.mxu0 %v596_v59  ;;  %v646_v59 = vld [vmem:[%s7871_s1 + $0x3c8] sm:$0xff] }
  0xe0   : > { %909 = vmatmul.mubr.f32.gmra.mrb[70].mxu0 %v595_v60 }
  0xe1   : > { %913 = vmatprep.mubr.f32.mxu0 %v598_v61 }
  0xe4   : > { %914 = vmatmul.mubr.f32.gmra.mrb[72].mxu0 %v597_v62  ;;  %v645_v62 = vld [vmem:[%s7871_s1 + $0x3c0] sm:$0xff] }
  0xe5   : > { %918 = vmatprep.mubr.f32.mxu0 %v600_v63  ;;  %v648_v63 = vld [vmem:[%s7871_s1 + $0x3d8] sm:$0xff] }
  0xe8   : > { %919 = vmatmul.mubr.f32.gmra.mrb[74].mxu0 %v599_v0 }
  0xe9   : > { %923 = vmatprep.mubr.f32.mxu0 %v602_v1 }
  0xec   : > { %924 = vmatmul.mubr.f32.gmra.mrb[76].mxu0 %v601_v3  ;;  %v647_v3 = vld [vmem:[%s7871_s1 + $0x3d0] sm:$0xff] }
  0xed   : > { %928 = vmatprep.mubr.f32.mxu0 %v604_v4  ;;  %v650_v4 = vld [vmem:[%s7871_s1 + $0x3e8] sm:$0xff] }
  0xf0   : > { %929 = vmatmul.mubr.f32.gmra.mrb[78].mxu0 %v603_v5 }
  0xf1   : > { %933 = vmatprep.mubr.f32.mxu0 %v606_v6 }
  0xf4   : > { %934 = vmatmul.mubr.f32.gmra.mrb[80].mxu0 %v605_v7  ;;  %v649_v7 = vld [vmem:[%s7871_s1 + $0x3e0] sm:$0xff] }
  0xf5   : > { %938 = vmatprep.mubr.f32.mxu0 %v608_v8  ;;  %v652_v8 = vld [vmem:[%s7871_s1 + $0x3f8] sm:$0xff] }
  0xf8   : > { %939 = vmatmul.mubr.f32.gmra.mrb[82].mxu0 %v607_v9 }
  0xf9   : > { %943 = vmatprep.mubr.f32.mxu0 %v610_v10  ;;  %v7037_v10 = vld [vmem:[%s7872_s2 + $0x8] sm:$0xff] }
  0xfc   : > { %944 = vmatmul.mubr.f32.gmra.mrb[84].mxu0 %v609_v11 }
  0xfd   : > { %948 = vmatprep.mubr.f32.mxu0 %v612_v12  ;;  %v651_v12 = vld [vmem:[%s7871_s1 + $0x3f0] sm:$0xff] }
 0x100   : > { %949 = vmatmul.mubr.f32.gmra.mrb[86].mxu0 %v611_v13  ;;  %v654_v13 = vld [vmem:[%s7871_s1 + $0x408] sm:$0xff] }
 0x101   : > { %953 = vmatprep.mubr.f32.mxu0 %v614_v14 }
 0x104   : > { %954 = vmatmul.mubr.f32.gmra.mrb[88].mxu0 %v613_v15 }
 0x105   : > { %958 = vmatprep.mubr.f32.mxu0 %v616_v16  ;;  %v653_v16 = vld [vmem:[%s7871_s1 + $0x400] sm:$0xff] }
 0x108   : > { %959 = vmatmul.mubr.f32.gmra.mrb[90].mxu0 %v615_v17 }
 0x109   : > { %963 = vmatprep.mubr.f32.mxu0 %v618_v18 }
 0x10c   : > { %964 = vmatmul.mubr.f32.gmra.mrb[92].mxu0 %v617_v19  ;;  %v655_v19 = vld [vmem:[%s7871_s1 + $0x410] sm:$0xff] }
 0x10d   : > { %968 = vmatprep.mubr.f32.mxu0 %v620_v20  ;;  %v658_v20 = vld [vmem:[%s7871_s1 + $0x428] sm:$0xff] }
 0x110   : > { %969 = vmatmul.mubr.f32.gmra.mrb[94].mxu0 %v619_v21 }
 0x111   : > { %973 = vmatprep.mubr.f32.mxu0 %v622_v22 }
 0x114   : > { %974 = vmatmul.mubr.f32.gmra.mrb[96].mxu0 %v621_v23  ;;  %v657_v23 = vld [vmem:[%s7871_s1 + $0x420] sm:$0xff] }
 0x115   : > { %978 = vmatprep.mubr.f32.mxu0 %v624_v24  ;;  %v660_v24 = vld [vmem:[%s7871_s1 + $0x438] sm:$0xff] }
 0x118   : > { %979 = vmatmul.mubr.f32.gmra.mrb[98].mxu0 %v623_v25 }
 0x119   : > { %983 = vmatprep.mubr.f32.mxu0 %v626_v26 }
 0x11c   : > { %984 = vmatmul.mubr.f32.gmra.mrb[100].mxu0 %v625_v27  ;;  %v659_v27 = vld [vmem:[%s7871_s1 + $0x430] sm:$0xff] }
 0x11d   : > { %988 = vmatprep.mubr.f32.mxu0 %v628_v28  ;;  %v662_v28 = vld [vmem:[%s7871_s1 + $0x448] sm:$0xff] }
 0x120   : > { %989 = vmatmul.mubr.f32.gmra.mrb[102].mxu0 %v627_v29 }
 0x121   : > { %993 = vmatprep.mubr.f32.mxu0 %v630_v30 }
 0x124   : > { %994 = vmatmul.mubr.f32.gmra.mrb[104].mxu0 %v629_v31  ;;  %v661_v31 = vld [vmem:[%s7871_s1 + $0x440] sm:$0xff] }
 0x125   : > { %998 = vmatprep.mubr.f32.mxu0 %v632_v32  ;;  %v664_v32 = vld [vmem:[%s7871_s1 + $0x458] sm:$0xff] }
 0x127   : > { %v6963_v35 = vpop.f32.mrb[0].mxu0 }
 0x128   : > { %v737_v36 = vpop.f32.mrb[1].mxu0  ;;  %999 = vmatmul.mubr.f32.gmra.mrb[106].mxu0 %v631_v33 }
 0x129   : > { %1003 = vmatprep.mubr.f32.mxu0 %v634_v34  ;;  %v663_v36 = vld [vmem:[%s7871_s1 + $0x450] sm:$0xff] }
 0x12b   : > { %v6971_v39 = vpop.f32.mrb[2].mxu0 }
 0x12c   : > { %v742_v40 = vpop.f32.mrb[3].mxu0  ;;  %1004 = vmatmul.mubr.f32.gmra.mrb[108].mxu0 %v633_v37  ;;  %v666_v37 = vld [vmem:[%s7871_s1 + $0x468] sm:$0xff] }
 0x12d   : > { %1008 = vmatprep.mubr.f32.mxu0 %v636_v38  ;;  %v1505_v40 = vrot.slane %v7037_v10, 4 }
 0x12f   : > { %v6979_v43 = vpop.f32.mrb[4].mxu0 }
 0x130   : > { %v747_v44 = vpop.f32.mrb[5].mxu0  ;;  %1009 = vmatmul.mubr.f32.gmra.mrb[110].mxu0 %v635_v41 }
 0x131   : > { %1013 = vmatprep.mubr.f32.mxu0 %v638_v42  ;;  %v668_v42 = vld [vmem:[%s7871_s1 + $0x478] sm:$0xff] }
 0x133   : > { %v6987_v47 = vpop.f32.mrb[6].mxu0 }
 0x134   : > { %v752_v49 = vpop.f32.mrb[7].mxu0  ;;  %1014 = vmatmul.mubr.f32.gmra.mrb[112].mxu0 %v637_v45 }
 0x135   : > { %1018 = vmatprep.mubr.f32.mxu0 %v640_v46 }
 0x137   : > { %v6995_v52 = vpop.f32.mrb[8].mxu0 }
 0x138   : > { %v757_v53 = vpop.f32.mrb[9].mxu0  ;;  %1019 = vmatmul.mubr.f32.gmra.mrb[114].mxu0 %v639_v50 }
 0x139   : > { %1023 = vmatprep.mubr.f32.mxu0 %v642_v51  ;;  %v1096_v51 = vld [vmem:[%s7872_s2 + $0x10] sm:$0xff] }
 0x13b   : > { %v7003_v56 = vpop.f32.mrb[10].mxu0 }
 0x13c   : > { %v762_v57 = vpop.f32.mrb[11].mxu0  ;;  %1024 = vmatmul.mubr.f32.gmra.mrb[116].mxu0 %v641_v54 }
 0x13d   : > { %1028 = vmatprep.mubr.f32.mxu0 %v644_v55 }
 0x13f   : > { %v7011_v60 = vpop.f32.mrb[12].mxu0 }
 0x140   : > { %v767_v61 = vpop.f32.mrb[13].mxu0  ;;  %1029 = vmatmul.mubr.f32.gmra.mrb[118].mxu0 %v643_v58 }
 0x141   : > { %1033 = vmatprep.mubr.f32.mxu0 %v646_v59  ;;  %v1785_v61 = vrot.slane %v1096_v51, 4 }
 0x143   : > { %v7019_v0 = vpop.f32.mrb[14].mxu0 }
 0x144   : > { %v772_v1 = vpop.f32.mrb[15].mxu0  ;;  %1034 = vmatmul.mubr.f32.gmra.mrb[120].mxu0 %v645_v62 }
 0x145   : > { %1038 = vmatprep.mubr.f32.mxu0 %v648_v63 }
 0x147   : > { %v775_v5 = vpop.f32.mrb[16].mxu0 }
 0x148   : > { %v777_v6 = vpop.f32.mrb[17].mxu0  ;;  %1039 = vmatmul.mubr.f32.gmra.mrb[122].mxu0 %v647_v3  ;;  %5583 = vmatprep.mubr.msk.f32.mxu1 %vm1101_vm1, %v775_v5 }
 0x149   : > { %1043 = vmatprep.mubr.f32.mxu0 %v650_v4 }
 0x14b   : > { %v780_v9 = vpop.f32.mrb[18].mxu0 }
 0x14c   : > { %v782_v11 = vpop.f32.mrb[19].mxu0  ;;  %1044 = vmatmul.mubr.f32.gmra.mrb[124].mxu0 %v649_v7  ;;  %5584 = vmatmul.mubr.msk.f32.vlgmr.msra.gmra.mrb[0].mxu1 %vm1101_vm1, %v780_v9 }
 0x14d   : > { %1048 = vmatprep.mubr.f32.mxu0 %v652_v8  ;;  %5596 = vmatpush3.msk.msra.mxu1 %vm1126_vm0, %v6812_v48  ;;  %v656_v48 = vld [vmem:[%s7871_s1 + $0x418] sm:$0xff] }
 0x14e   : > { %5609 = vmatprep.subr.msk.mxu1 %vm1126_vm0, %v7037_v10 }
 0x14f   : > { %v785_v14 = vpop.f32.mrb[20].mxu0 }
 0x150   : > { %v787_v15 = vpop.f32.mrb[21].mxu0  ;;  %1049 = vmatmul.mubr.f32.gmra.mrb[126].mxu0 %v651_v12  ;;  %5586 = vmatprep.mubr.msk.f32.mxu1 %vm1101_vm1, %v785_v14 }
 0x151   : > { %1053 = vmatprep.mubr.f32.mxu0 %v654_v13 }
 0x153   : > { %v790_v17 = vpop.f32.mrb[22].mxu0 }
 0x154   : > { %v792_v18 = vpop.f32.mrb[23].mxu0  ;;  %1054 = vmatmul.mubr.f32.gmra.mrb[128].mxu0 %v653_v16  ;;  %5587 = vmatmul.mubr.msk.f32.gmra.mrb[2].mxu1 %vm1101_vm1, %v790_v17  ;;  %v1097_v16 = vld [vmem:[%s7872_s2 + $0x18] sm:$0xff] }
 0x155   : > { %1058 = vmatprep.mubr.f32.mxu0 %v656_v48 }
 0x157   : > { %v795_v21 = vpop.f32.mrb[24].mxu0 }
 0x158   : > { %v797_v22 = vpop.f32.mrb[25].mxu0  ;;  %1059 = vmatmul.mubr.f32.gmra.mrb[130].mxu0 %v655_v19  ;;  %5589 = vmatprep.mubr.msk.f32.mxu1 %vm1101_vm1, %v795_v21 }
 0x159   : > { %1063 = vmatprep.mubr.f32.mxu0 %v658_v20 }
 0x15b   : > { %v800_v25 = vpop.f32.mrb[26].mxu0 }
 0x15c   : > { %v802_v26 = vpop.f32.mrb[27].mxu0  ;;  %1064 = vmatmul.mubr.f32.gmra.mrb[132].mxu0 %v657_v23  ;;  %5590 = vmatmul.mubr.msk.f32.gmra.mrb[4].mxu1 %vm1101_vm1, %v800_v25 }
 0x15d   : > { %1068 = vmatprep.mubr.f32.mxu0 %v660_v24 }
 0x15f   : > { %v805_v29 = vpop.f32.mrb[28].mxu0 }
 0x160   : > { %v807_v30 = vpop.f32.mrb[29].mxu0  ;;  %1069 = vmatmul.mubr.f32.gmra.mrb[134].mxu0 %v659_v27  ;;  %5592 = vmatprep.mubr.msk.f32.mxu1 %vm1101_vm1, %v805_v29 }
 0x161   : > { %1073 = vmatprep.mubr.f32.mxu0 %v662_v28 }
 0x163   : > { %v810_v33 = vpop.f32.mrb[30].mxu0 }
 0x164   : > { %v812_v34 = vpop.f32.mrb[31].mxu0  ;;  %1074 = vmatmul.mubr.f32.gmra.mrb[136].mxu0 %v661_v31  ;;  %5593 = vmatmul.mubr.msk.f32.gmra.mrb[6].mxu1 %vm1101_vm1, %v810_v33  ;;  %v2065_v31 = vrot.slane %v1097_v16, 4 }
 0x165   : > { %5597 = vmatprep.mubr.msk.f32.mxu1 %vm1101_vm1, %v6963_v35  ;;  %1078 = vmatprep.mubr.f32.mxu0 %v664_v32  ;;  %v665_v35 = vld [vmem:[%s7871_s1 + $0x460] sm:$0xff] }
 0x167   : > { %v815_v38 = vpop.f32.mrb[32].mxu0 }
 0x168   : > { %v817_v41 = vpop.f32.mrb[33].mxu0  ;;  %1079 = vmatmul.mubr.f32.gmra.mrb[138].mxu0 %v663_v36  ;;  %5598 = vmatmul.mubr.msk.f32.vlgmr.msra.gmra.mrb[0].mxu1 %vm1101_vm1, %v6971_v39  ;;  %v667_v39 = vld [vmem:[%s7871_s1 + $0x470] sm:$0xff] }
 0x169   : > { %5600 = vmatprep.mubr.msk.f32.mxu1 %vm1101_vm1, %v6979_v43  ;;  %1083 = vmatprep.mubr.f32.mxu0 %v666_v37 }
 0x16a   : > { %5610 = vmatpush3.msk.msra.mxu1 %vm1126_vm0, %v7037_v10 }
 0x16b   : > { %v820_v44 = vpop.f32.mrb[34].mxu0  ;;  %5623 = vmatprep.subr.msk.mxu1 %vm1126_vm0, %v1505_v40 }
 0x16c   : > { %v822_v45 = vpop.f32.mrb[35].mxu0  ;;  %1084 = vmatmul.mubr.f32.gmra.mrb[140].mxu0 %v665_v35  ;;  %5601 = vmatmul.mubr.msk.f32.gmra.mrb[2].mxu1 %vm1101_vm1, %v6987_v47 }
 0x16d   : > { %5603 = vmatprep.mubr.msk.f32.mxu1 %vm1101_vm1, %v6995_v52  ;;  %1088 = vmatprep.mubr.f32.mxu0 %v668_v42 }
 0x16f   : > { %v825_v43 = vpop.f32.mrb[36].mxu0 }
 0x170   : > { %v827_v46 = vpop.f32.mrb[37].mxu0  ;;  %1089 = vmatmul.mubr.f32.gmra.mrb[142].mxu0 %v667_v39  ;;  %5604 = vmatmul.mubr.msk.f32.gmra.mrb[4].mxu1 %vm1101_vm1, %v7003_v56 }
 0x171   : > { %5606 = vmatprep.mubr.msk.f32.mxu1 %vm1101_vm1, %v7011_v60 }
 0x173   : > { %v830_v49 = vpop.f32.mrb[38].mxu0 }
 0x174   : > { %v832_v50 = vpop.f32.mrb[39].mxu0  ;;  %5607 = vmatmul.mubr.msk.f32.gmra.mrb[6].mxu1 %vm1101_vm1, %v7019_v0 }
 0x175   : > { %5611 = vmatprep.mubr.msk.f32.mxu1 %vm1101_vm1, %v815_v38 }
 0x177   : > { %v835_v47 = vpop.f32.mrb[40].mxu0 }
 0x178   : > { %v837_v52 = vpop.f32.mrb[41].mxu0  ;;  %5612 = vmatmul.mubr.msk.f32.vlgmr.msra.gmra.mrb[0].mxu1 %vm1101_vm1, %v820_v44 }
 0x179   : > { %5614 = vmatprep.mubr.msk.f32.mxu1 %vm1101_vm1, %v825_v43  ;;  %5624 = vmatpush3.msk.msra.mxu1 %vm1126_vm0, %v1505_v40 }
 0x17a   : > { %5637 = vmatprep.subr.msk.mxu1 %vm1126_vm0, %v1096_v51 }
 0x17b   : > { %v840_v53 = vpop.f32.mrb[42].mxu0 }
 0x17c   : > { %v842_v54 = vpop.f32.mrb[43].mxu0  ;;  %5615 = vmatmul.mubr.msk.f32.gmra.mrb[2].mxu1 %vm1101_vm1, %v830_v49 }
 0x17d   : > { %5617 = vmatprep.mubr.msk.f32.mxu1 %vm1101_vm1, %v835_v47  ;;  %v1098_v47 = vld [vmem:[%s7872_s2 + $0x20] sm:$0xf] }
 0x17f   : > { %v845_v55 = vpop.f32.mrb[44].mxu0 }
 0x180   : > { %v847_v56 = vpop.f32.mrb[45].mxu0  ;;  %5618 = vmatmul.mubr.msk.f32.gmra.mrb[4].mxu1 %vm1101_vm1, %v840_v53 }
 0x181   : > { %5620 = vmatprep.mubr.msk.f32.mxu1 %vm1101_vm1, %v845_v55 }
 0x183   : > { %v850_v57 = vpop.f32.mrb[46].mxu0 }
 0x184   : > { %v852_v58 = vpop.f32.mrb[47].mxu0  ;;  %5621 = vmatmul.mubr.msk.f32.gmra.mrb[6].mxu1 %vm1101_vm1, %v850_v57 }
 0x187   : > { %v855_v59 = vpop.f32.mrb[48].mxu0 }
 0x188   : > { %v857_v60 = vpop.f32.mrb[49].mxu0  ;;  %5625 = vmatprep.mubr.msk.f32.mxu1 %vm1101_vm1, %v855_v59 }
 0x18b   : > { %v860_v62 = vpop.f32.mrb[50].mxu0 }
 0x18c   : > { %v862_v63 = vpop.f32.mrb[51].mxu0  ;;  %5626 = vmatmul.mubr.msk.f32.vlgmr.msra.gmra.mrb[0].mxu1 %vm1101_vm1, %v860_v62 }
 0x18d   : > { %5638 = vmatpush3.msk.msra.mxu1 %vm1126_vm0, %v1096_v51 }
 0x18e   : > { %5651 = vmatprep.subr.msk.mxu1 %vm1126_vm0, %v1785_v61 }
 0x18f   : > { %v865_v0 = vpop.f32.mrb[52].mxu0 }
 0x190   : > { %v867_v1 = vpop.f32.mrb[53].mxu0  ;;  %5628 = vmatprep.mubr.msk.f32.mxu1 %vm1101_vm1, %v865_v0 }
 0x193   : > { %v870_v3 = vpop.f32.mrb[54].mxu0 }
 0x194   : > { %v872_v4 = vpop.f32.mrb[55].mxu0  ;;  %5629 = vmatmul.mubr.msk.f32.gmra.mrb[2].mxu1 %vm1101_vm1, %v870_v3 }
 0x197   : > { %v875_v5 = vpop.f32.mrb[56].mxu0 }
 0x198   : > { %v877_v6 = vpop.f32.mrb[57].mxu0  ;;  %5631 = vmatprep.mubr.msk.f32.mxu1 %vm1101_vm1, %v875_v5 }
 0x19b   : > { %v880_v7 = vpop.f32.mrb[58].mxu0 }
 0x19c   : > { %v882_v8 = vpop.f32.mrb[59].mxu0  ;;  %5632 = vmatmul.mubr.msk.f32.gmra.mrb[4].mxu1 %vm1101_vm1, %v880_v7 }
 0x19f   : > { %v885_v9 = vpop.f32.mrb[60].mxu0 }
 0x1a0   : > { %v887_v10 = vpop.f32.mrb[61].mxu0  ;;  %5634 = vmatprep.mubr.msk.f32.mxu1 %vm1101_vm1, %v885_v9 }
 0x1a3   : > { %v890_v11 = vpop.f32.mrb[62].mxu0 }
 0x1a4   : > { %v892_v12 = vpop.f32.mrb[63].mxu0  ;;  %5635 = vmatmul.mubr.msk.f32.gmra.mrb[6].mxu1 %vm1101_vm1, %v890_v11 }
 0x1a7   : > { %v895_v13 = vpop.f32.mrb[64].mxu0 }
 0x1a8   : > { %v897_v14 = vpop.f32.mrb[65].mxu0  ;;  %5639 = vmatprep.mubr.msk.f32.mxu1 %vm1101_vm1, %v895_v13 }
 0x1ab   : > { %v900_v15 = vpop.f32.mrb[66].mxu0 }
 0x1ac   : > { %v902_v48 = vpop.f32.mrb[67].mxu0  ;;  %5640 = vmatmul.mubr.msk.f32.vlgmr.msra.gmra.mrb[0].mxu1 %vm1101_vm1, %v900_v15 }
 0x1ad   : > { %5652 = vmatpush3.msk.msra.mxu1 %vm1126_vm0, %v1785_v61 }
 0x1ae   : > { %5665 = vmatprep.subr.msk.mxu1 %vm1126_vm0, %v1097_v16 }
 0x1af   : > { %v905_v17 = vpop.f32.mrb[68].mxu0 }
 0x1b0   : > { %v907_v18 = vpop.f32.mrb[69].mxu0  ;;  %5642 = vmatprep.mubr.msk.f32.mxu1 %vm1101_vm1, %v905_v17 }
 0x1b3   : > { %v910_v19 = vpop.f32.mrb[70].mxu0 }
 0x1b4   : > { %v912_v20 = vpop.f32.mrb[71].mxu0  ;;  %5643 = vmatmul.mubr.msk.f32.gmra.mrb[2].mxu1 %vm1101_vm1, %v910_v19 }
 0x1b7   : > { %v915_v21 = vpop.f32.mrb[72].mxu0 }
 0x1b8   : > { %v917_v22 = vpop.f32.mrb[73].mxu0  ;;  %5645 = vmatprep.mubr.msk.f32.mxu1 %vm1101_vm1, %v915_v21 }
 0x1bb   : > { %v920_v23 = vpop.f32.mrb[74].mxu0 }
 0x1bc   : > { %v922_v24 = vpop.f32.mrb[75].mxu0  ;;  %5646 = vmatmul.mubr.msk.f32.gmra.mrb[4].mxu1 %vm1101_vm1, %v920_v23 }
 0x1bf   : > { %v925_v25 = vpop.f32.mrb[76].mxu0 }
 0x1c0   : > { %v927_v26 = vpop.f32.mrb[77].mxu0  ;;  %5648 = vmatprep.mubr.msk.f32.mxu1 %vm1101_vm1, %v925_v25 }
 0x1c3   : > { %v930_v27 = vpop.f32.mrb[78].mxu0 }
 0x1c4   : > { %v932_v28 = vpop.f32.mrb[79].mxu0  ;;  %5649 = vmatmul.mubr.msk.f32.gmra.mrb[6].mxu1 %vm1101_vm1, %v930_v27 }
 0x1c7   : > { %v935_v29 = vpop.f32.mrb[80].mxu0 }
 0x1c8   : > { %v937_v30 = vpop.f32.mrb[81].mxu0  ;;  %5653 = vmatprep.mubr.msk.f32.mxu1 %vm1101_vm1, %v935_v29 }
 0x1cb   : > { %v940_v32 = vpop.f32.mrb[82].mxu0 }
 0x1cc   : > { %v942_v33 = vpop.f32.mrb[83].mxu0  ;;  %5654 = vmatmul.mubr.msk.f32.vlgmr.msra.gmra.mrb[0].mxu1 %vm1101_vm1, %v940_v32  ;;  %v2406_v32 = vld [vmem:[%s7874_s4] sm:$0xff] }
 0x1cd   : > { %5666 = vmatpush3.msk.msra.mxu1 %vm1126_vm0, %v1097_v16  ;;  %v2346_v33 = vlaneseq }
 0x1ce   : > { %5679 = vmatprep.subr.msk.mxu1 %vm1126_vm0, %v2065_v31 }
 0x1cf   : > { %v945_v34 = vpop.f32.mrb[84].mxu0 }
 0x1d0   : > { %v947_v36 = vpop.f32.mrb[85].mxu0  ;;  %5656 = vmatprep.mubr.msk.f32.mxu1 %vm1101_vm1, %v945_v34  ;;  %v2347_v34 = vshrl.u32 %v2346_v33, 7 }
 0x1d2   : > { %v7201_v36 = vsub.s32 0, %v2347_v34 }
 0x1d3   : > { %v950_v37 = vpop.f32.mrb[86].mxu0 }
 0x1d4   : > { %v952_v38 = vpop.f32.mrb[87].mxu0  ;;  %5657 = vmatmul.mubr.msk.f32.gmra.mrb[2].mxu1 %vm1101_vm1, %v950_v37  ;;  %v2345_v37 = vld [vmem:[%s7873_s3] sm:$0x7] }
 0x1d5   : > { %v2349_v38 = vrot.slane %v2345_v37, %v7201_v36 }
 0x1d7   : > { %v955_v40 = vpop.f32.mrb[88].mxu0 }
 0x1d8   : > { %v957_v41 = vpop.f32.mrb[89].mxu0  ;;  %5659 = vmatprep.mubr.msk.f32.mxu1 %vm1101_vm1, %v955_v40  ;;  %v7207_v40 = vsub.s32 1, %v2347_v34 }
 0x1db   : > { %v960_v35 = vpop.f32.mrb[90].mxu0 }
 0x1dc   : > { %v962_v42 = vpop.f32.mrb[91].mxu0  ;;  %5660 = vmatmul.mubr.msk.f32.gmra.mrb[4].mxu1 %vm1101_vm1, %v960_v35  ;;  %v7209_v35 = vsub.s32 2, %v2347_v34  ;;  %v2407_v34 = vld [vmem:[%s7874_s4 + $0x8] sm:$0xff] }
 0x1df   : > { %v965_v44 = vpop.f32.mrb[92].mxu0 }
 0x1e0   : > { %v967_v45 = vpop.f32.mrb[93].mxu0  ;;  %5662 = vmatprep.mubr.msk.f32.mxu1 %vm1101_vm1, %v965_v44 }
 0x1e1   : > { %v2385_v45 = vrot.slane %v2345_v37, %v7207_v40 }
 0x1e3   : > { %v970_v39 = vpop.f32.mrb[94].mxu0 }
 0x1e4   : > { %v972_v43 = vpop.f32.mrb[95].mxu0  ;;  %5663 = vmatmul.mubr.msk.f32.gmra.mrb[6].mxu1 %vm1101_vm1, %v970_v39 }
 0x1e7   : > { %v975_v46 = vpop.f32.mrb[96].mxu0 }
 0x1e8   : > { %v977_v49 = vpop.f32.mrb[97].mxu0  ;;  %5667 = vmatprep.mubr.msk.f32.mxu1 %vm1101_vm1, %v975_v46  ;;  %v2397_v46 = vrot.slane %v2345_v37, %v7209_v35  ;;  %v2408_v37 = vld [vmem:[%s7874_s4 + $0x10] sm:$0xff] }
 0x1eb   : > { %v980_v50 = vpop.f32.mrb[98].mxu0 }
 0x1ec   : > { %v982_v51 = vpop.f32.mrb[99].mxu0  ;;  %5668 = vmatmul.mubr.msk.f32.vlgmr.msra.gmra.mrb[0].mxu1 %vm1101_vm1, %v980_v50 }
 0x1ed   : > { %5680 = vmatpush3.msk.msra.mxu1 %vm1126_vm0, %v2065_v31 }
 0x1ee   : > { %5693 = vmatprep.subr.msk.mxu1 %vm1126_vm0, %v1098_v47 }
 0x1ef   : > { %v985_v52 = vpop.f32.mrb[100].mxu0 }
 0x1f0   : > { %v987_v53 = vpop.f32.mrb[101].mxu0  ;;  %5670 = vmatprep.mubr.msk.f32.mxu1 %vm1101_vm1, %v985_v52 }
 0x1f3   : > { %v990_v54 = vpop.f32.mrb[102].mxu0 }
 0x1f4   : > { %v992_v55 = vpop.f32.mrb[103].mxu0  ;;  %5671 = vmatmul.mubr.msk.f32.gmra.mrb[2].mxu1 %vm1101_vm1, %v990_v54 }
 0x1f7   : > { %v995_v56 = vpop.f32.mrb[104].mxu0 }
 0x1f8   : > { %v997_v57 = vpop.f32.mrb[105].mxu0  ;;  %5673 = vmatprep.mubr.msk.f32.mxu1 %vm1101_vm1, %v995_v56 }
 0x1fb   : > { %v1000_v58 = vpop.f32.mrb[106].mxu0 }
 0x1fc   : > { %v1002_v59 = vpop.f32.mrb[107].mxu0  ;;  %5674 = vmatmul.mubr.msk.f32.gmra.mrb[4].mxu1 %vm1101_vm1, %v1000_v58 }
 0x1ff   : > { %v1005_v60 = vpop.f32.mrb[108].mxu0 }
 0x200   : > { %v1007_v61 = vpop.f32.mrb[109].mxu0  ;;  %5676 = vmatprep.mubr.msk.f32.mxu1 %vm1101_vm1, %v1005_v60 }
 0x203   : > { %v1010_v62 = vpop.f32.mrb[110].mxu0 }
 0x204   : > { %v1012_v63 = vpop.f32.mrb[111].mxu0  ;;  %5677 = vmatmul.mubr.msk.f32.gmra.mrb[6].mxu1 %vm1101_vm1, %v1010_v62 }
 0x207   : > { %v1015_v0 = vpop.f32.mrb[112].mxu0 }
 0x208   : > { %v1017_v1 = vpop.f32.mrb[113].mxu0  ;;  %5681 = vmatprep.mubr.msk.f32.mxu1 %vm1101_vm1, %v1015_v0 }
 0x20b   : > { %v1020_v3 = vpop.f32.mrb[114].mxu0 }
 0x20c   : > { %v1022_v4 = vpop.f32.mrb[115].mxu0  ;;  %5682 = vmatmul.mubr.msk.f32.vlgmr.msra.gmra.mrb[0].mxu1 %vm1101_vm1, %v1020_v3 }
 0x20d   : > { %5694 = vmatpush3.msk.msra.mxu1 %vm1126_vm0, %v1098_v47 }
 0x20f   : > { %v1025_v5 = vpop.f32.mrb[116].mxu0 }
 0x210   : > { %v1027_v6 = vpop.f32.mrb[117].mxu0  ;;  %5684 = vmatprep.mubr.msk.f32.mxu1 %vm1101_vm1, %v1025_v5 }
 0x213   : > { %v1030_v7 = vpop.f32.mrb[118].mxu0 }
 0x214   : > { %v1032_v8 = vpop.f32.mrb[119].mxu0  ;;  %5685 = vmatmul.mubr.msk.f32.gmra.mrb[2].mxu1 %vm1101_vm1, %v1030_v7 }
 0x217   : > { %v1035_v9 = vpop.f32.mrb[120].mxu0 }
 0x218   : > { %v1037_v10 = vpop.f32.mrb[121].mxu0  ;;  %5687 = vmatprep.mubr.msk.f32.mxu1 %vm1101_vm1, %v1035_v9 }
 0x21b   : > { %v1040_v11 = vpop.f32.mrb[122].mxu0 }
 0x21c   : > { %v1042_v12 = vpop.f32.mrb[123].mxu0  ;;  %5688 = vmatmul.mubr.msk.f32.gmra.mrb[4].mxu1 %vm1101_vm1, %v1040_v11 }
 0x21f   : > { %v1045_v13 = vpop.f32.mrb[124].mxu0 }
 0x220   : > { %v1047_v14 = vpop.f32.mrb[125].mxu0  ;;  %5690 = vmatprep.mubr.msk.f32.mxu1 %vm1101_vm1, %v1045_v13 }
 0x223   : > { %v1050_v15 = vpop.f32.mrb[126].mxu0 }
 0x224   : > { %v1052_v16 = vpop.f32.mrb[127].mxu0  ;;  %5691 = vmatmul.mubr.msk.f32.gmra.mrb[6].mxu1 %vm1101_vm1, %v1050_v15 }
 0x227   : > { %v1055_v48 = vpop.f32.mrb[128].mxu0 }
 0x228   : > { %v1057_v17 = vpop.f32.mrb[129].mxu0  ;;  %5695 = vmatprep.mubr.msk.f32.mxu1 %vm1101_vm1, %v1055_v48 }
 0x22b   : > { %v1060_v18 = vpop.f32.mrb[130].mxu0 }
 0x22c   : > { %v1062_v19 = vpop.f32.mrb[131].mxu0  ;;  %5696 = vmatmul.mubr.msk.f32.vlgmr.msra.gmra.mrb[0].mxu1 %vm1101_vm1, %v1060_v18 }
 0x22f   : > { %v1065_v20 = vpop.f32.mrb[132].mxu0 }
 0x230   : > { %v1067_v21 = vpop.f32.mrb[133].mxu0  ;;  %5698 = vmatprep.mubr.msk.f32.mxu1 %vm1101_vm1, %v1065_v20 }
 0x233   : > { %v1070_v22 = vpop.f32.mrb[134].mxu0 }
 0x234   : > { %v1072_v23 = vpop.f32.mrb[135].mxu0  ;;  %5699 = vmatmul.mubr.msk.f32.gmra.mrb[2].mxu1 %vm1101_vm1, %v1070_v22 }
 0x237   : > { %v1075_v24 = vpop.f32.mrb[136].mxu0 }
 0x238   : > { %v1077_v25 = vpop.f32.mrb[137].mxu0  ;;  %5701 = vmatprep.mubr.msk.f32.mxu1 %vm1101_vm1, %v1075_v24 }
 0x23b   : > { %v1080_v26 = vpop.f32.mrb[138].mxu0 }
 0x23c   : > { %v1082_v27 = vpop.f32.mrb[139].mxu0  ;;  %5702 = vmatmul.mubr.msk.f32.gmra.mrb[4].mxu1 %vm1101_vm1, %v1080_v26 }
 0x23f   : > { %v1085_v28 = vpop.f32.mrb[140].mxu0 }
 0x240   : > { %v1087_v29 = vpop.f32.mrb[141].mxu0  ;;  %5704 = vmatprep.mubr.msk.f32.mxu1 %vm1101_vm1, %v1085_v28 }
 0x241   : > { %v2636_v29 = vld [vmem:[%s7875_s5 + $0x10] sm:$0xff] }
 0x243   : > { %v1090_v30 = vpop.f32.mrb[142].mxu0 }
 0x244   : > { %v1092_v31 = vpop.f32.mrb[143].mxu0  ;;  %5705 = vmatmul.mubr.msk.f32.gmra.mrb[6].mxu1 %vm1101_vm1, %v1090_v30  ;;  %v2637_v30 = vld [vmem:[%s7875_s5 + $0x18] sm:$0xff] }
 0x245   : > { %5723 = vmatprep.mubr.msk.f32.mxu1 %vm2424_vm2, %v2406_v32  ;;  %v6171_v33 = vpack.c.bf16 %v2637_v30, %v2636_v29  ;;  %v2650_v30 = vld [vmem:[%s7875_s5 + $0x80] sm:$0xff] }
 0x2ff   : > { %v5697_v41 = vpop.f32.mrb[0].mxu1 }
 0x300   : > { %v2351_v42 = vadd.f32 %v5697_v41, %v2349_v38  ;;  %v2298_v44 = vpop.f32.mrb[1].mxu1  ;;  %v2410_v41 = vld [vmem:[%s7874_s4 + $0x20] sm:$0xff] }
 0x301   : > { %v2350_v39 = vadd.f32 %v2349_v38, %v2298_v44  ;;  %v2412_v44 = vld [vmem:[%s7874_s4 + $0x30] sm:$0xff] }
 0x302   : > { %vm2359_vm3 = vcmp.ge.f32.partialorder %v2351_v42, 0.0  ;;  %v2367_v43 = vmul.f32 0.2, %v2351_v42 }
 0x303   : > { %vm2358_vm4 = vcmp.ge.f32.partialorder %v2350_v39, 0.0  ;;  %v2366_v49 = vmul.f32 0.2, %v2350_v39 }
 0x304   : > { %v2375_v50 = vsel %vm2359_vm3, %v2351_v42, %v2367_v43  ;;  %v2411_v42 = vld [vmem:[%s7874_s4 + $0x28] sm:$0xff] }
 0x305   : > { %v2387_v47 = vmul.f32 %v2385_v45, %v2375_v50  ;;  %v2374_v51 = vsel %vm2358_vm4, %v2350_v39, %v2366_v49  ;;  %v2414_v39 = vld [vmem:[%s7874_s4 + $0x40] sm:$0xff]  ;;  %v2415_v43 = vld [vmem:[%s7874_s4 + $0x48] sm:$0xff]  ;;  %v2417_v49 = vld [vmem:[%s7874_s4 + $0x58] sm:$0xff] }
 0x306   : > { %v2386_v52 = vmul.f32 %v2385_v45, %v2374_v51  ;;  %v2418_v50 = vld [vmem:[%s7874_s4 + $0x60] sm:$0xff]  ;;  %v2420_v51 = vld [vmem:[%s7874_s4 + $0x70] sm:$0xff] }
 0x307   : > { %v5700_v53 = vpop.f32.mrb[2].mxu1  ;;  %v2399_v54 = vadd.f32 %v2397_v46, %v2387_v47  ;;  %v2419_v47 = vld [vmem:[%s7874_s4 + $0x68] sm:$0xff] }
 0x308   : > { %v2353_v55 = vadd.f32 %v5700_v53, %v2349_v38  ;;  %v2308_v56 = vpop.f32.mrb[3].mxu1  ;;  %v2398_v57 = vadd.f32 %v2397_v46, %v2386_v52  ;;  %v2421_v52 = vld [vmem:[%s7874_s4 + $0x78] sm:$0xff]  ;;  %v2422_v53 = vld [vmem:[%s7874_s4 + $0x80] sm:$0xff] }
 0x309   : > { %v2352_v58 = vadd.f32 %v2349_v38, %v2308_v56  ;;  %v2635_v56 = vld [vmem:[%s7875_s5 + $0x8] sm:$0xff] }
 0x30a   : > { %vm2361_vm5 = vcmp.ge.f32.partialorder %v2353_v55, 0.0  ;;  %v2369_v59 = vmul.f32 0.2, %v2353_v55  ;;  %v6155_v60 = vpack.c.bf16 %v2399_v54, %v2398_v57  ;;  %v2423_v54 = vld [vmem:[%s7874_s4 + $0x88] sm:$0xff] }
 0x30b   : > { %vm2360_vm6 = vcmp.ge.f32.partialorder %v2352_v58, 0.0  ;;  %v2368_v61 = vmul.f32 0.2, %v2352_v58 }
 0x30c   : > { %v2377_v62 = vsel %vm2361_vm5, %v2353_v55, %v2369_v59  ;;  %6156 = vmatprep.subr.bf16.mxu1 %v6155_v60  ;;  %v2634_v55 = vld [vmem:[%s7875_s5] sm:$0xff] }
 0x30d   : > { %v2389_v63 = vmul.f32 %v2385_v45, %v2377_v62  ;;  %v2376_v0 = vsel %vm2360_vm6, %v2352_v58, %v2368_v61  ;;  %6158 = vmatpush3.bf16.msra.mxu1 %v6155_v60  ;;  %v6175_v57 = vpack.c.bf16 %v2635_v56, %v2634_v55  ;;  %v2638_v60 = vld [vmem:[%s7875_s5 + $0x20] sm:$0xff]  ;;  %v2639_v61 = vld [vmem:[%s7875_s5 + $0x28] sm:$0xff] }
 0x30e   : > { %v2388_v1 = vmul.f32 %v2385_v45, %v2376_v0  ;;  %v6179_v0 = vpack.c.bf16 %v2639_v61, %v2638_v60  ;;  %v3536_v55 = vld [vmem:[%s7878_s8 + $0x28] sm:$0xff]  ;;  %v3538_v60 = vld [vmem:[%s7878_s8 + $0x38] sm:$0xff] }
 0x30f   : > { %v5703_v3 = vpop.f32.mrb[4].mxu1  ;;  %v2401_v4 = vadd.f32 %v2397_v46, %v2389_v63  ;;  %v3422_v61 = vld [vmem:[%s7877_s7 + $0x8] sm:$0xff] }
 0x310   : > { %v2355_v5 = vadd.f32 %v5703_v3, %v2349_v38  ;;  %v2318_v6 = vpop.f32.mrb[5].mxu1  ;;  %v2400_v7 = vadd.f32 %v2397_v46, %v2388_v1 }
 0x311   : > { %v2354_v8 = vadd.f32 %v2349_v38, %v2318_v6 }
 0x312   : > { %vm2363_vm7 = vcmp.ge.f32.partialorder %v2355_v5, 0.0  ;;  %v2371_v9 = vmul.f32 0.2, %v2355_v5  ;;  %v6159_v10 = vpack.c.bf16 %v2401_v4, %v2400_v7  ;;  %v2640_v4 = vld [vmem:[%s7875_s5 + $0x30] sm:$0xff] }
 0x313   : > { %vm2362_vm8 = vcmp.ge.f32.partialorder %v2354_v8, 0.0  ;;  %v2370_v11 = vmul.f32 0.2, %v2354_v8 }
 0x314   : > { %v2379_v12 = vsel %vm2363_vm7, %v2355_v5, %v2371_v9  ;;  %6160 = vmatprep.subr.bf16.mxu1 %v6159_v10  ;;  %v2641_v5 = vld [vmem:[%s7875_s5 + $0x38] sm:$0xff] }
 0x315   : > { %v2391_v13 = vmul.f32 %v2385_v45, %v2379_v12  ;;  %v2378_v14 = vsel %vm2362_vm8, %v2354_v8, %v2370_v11  ;;  %6162 = vmatpush3.bf16.msra.mxu1 %v6159_v10  ;;  %v6183_v7 = vpack.c.bf16 %v2641_v5, %v2640_v4  ;;  %v2642_v11 = vld [vmem:[%s7875_s5 + $0x40] sm:$0xff]  ;;  %v2643_v12 = vld [vmem:[%s7875_s5 + $0x48] sm:$0xff] }
 0x316   : > { %v2390_v15 = vmul.f32 %v2385_v45, %v2378_v14  ;;  %v6187_v14 = vpack.c.bf16 %v2643_v12, %v2642_v11  ;;  %v3532_v4 = vld [vmem:[%s7878_s8 + $0x8] sm:$0xff] }
 0x317   : > { %v5706_v16 = vpop.f32.mrb[6].mxu1  ;;  %v2403_v48 = vadd.f32 %v2397_v46, %v2391_v13 }
 0x318   : > { %v2357_v17 = vadd.f32 %v5706_v16, %v2349_v38  ;;  %v2328_v18 = vpop.f32.mrb[7].mxu1  ;;  %v2402_v19 = vadd.f32 %v2397_v46, %v2390_v15 }
 0x319   : > { %v2356_v20 = vadd.f32 %v2349_v38, %v2328_v18  ;;  %v2409_v38 = vld [vmem:[%s7874_s4 + $0x18] sm:$0xff] }
 0x31a   : > { %vm2365_vm9 = vcmp.ge.f32.partialorder %v2357_v17, 0.0  ;;  %v2373_v21 = vmul.f32 0.2, %v2357_v17  ;;  %v6163_v22 = vpack.c.bf16 %v2403_v48, %v2402_v19  ;;  %v2645_v18 = vld [vmem:[%s7875_s5 + $0x58] sm:$0xff] }
 0x31b   : > { %vm2364_vm10 = vcmp.ge.f32.partialorder %v2356_v20, 0.0  ;;  %v2372_v23 = vmul.f32 0.2, %v2356_v20 }
 0x31c   : > { %v2381_v24 = vsel %vm2365_vm9, %v2357_v17, %v2373_v21  ;;  %6164 = vmatprep.subr.bf16.mxu1 %v6163_v22  ;;  %v2644_v17 = vld [vmem:[%s7875_s5 + $0x50] sm:$0xff] }
 0x31d   : > { %v2393_v25 = vmul.f32 %v2385_v45, %v2381_v24  ;;  %v2380_v26 = vsel %vm2364_vm10, %v2356_v20, %v2372_v23  ;;  %6166 = vmatpush3.bf16.msra.mxu1 %v6163_v22  ;;  %v6191_v20 = vpack.c.bf16 %v2645_v18, %v2644_v17  ;;  %v2646_v24 = vld [vmem:[%s7875_s5 + $0x60] sm:$0xff]  ;;  %v3541_v17 = vld [vmem:[%s7878_s8 + $0x50] sm:$0xff]  ;;  %v3542_v18 = vld [vmem:[%s7878_s8 + $0x58] sm:$0xff] }
 0x31e   : > { %v2392_v27 = vmul.f32 %v2385_v45, %v2380_v26  ;;  %v2413_v45 = vld [vmem:[%s7874_s4 + $0x38] sm:$0xff] }
 0x31f   : > { %v2405_v28 = vadd.f32 %v2397_v46, %v2393_v25  ;;  %v2647_v25 = vld [vmem:[%s7875_s5 + $0x68] sm:$0xff] }
 0x320   : > { %v2404_v31 = vadd.f32 %v2397_v46, %v2392_v27  ;;  %v2416_v46 = vld [vmem:[%s7874_s4 + $0x50] sm:$0xff]  ;;  %v6195_v26 = vpack.c.bf16 %v2647_v25, %v2646_v24 }
 0x321   : > { %v2648_v27 = vld [vmem:[%s7875_s5 + $0x70] sm:$0xff] }
 0x322   : > { %v6167_v32 = vpack.c.bf16 %v2405_v28, %v2404_v31  ;;  %v2649_v28 = vld [vmem:[%s7875_s5 + $0x78] sm:$0xff]  ;;  %v2651_v31 = vld [vmem:[%s7875_s5 + $0x88] sm:$0xff] }
 0x323   : > { %v6199_v29 = vpack.c.bf16 %v2649_v28, %v2648_v27  ;;  %v3545_v27 = vld [vmem:[%s7878_s8 + $0x70] sm:$0xff]  ;;  %v3546_v28 = vld [vmem:[%s7878_s8 + $0x78] sm:$0xff] }
 0x324   : > { %6168 = vmatprep.subr.bf16.mxu1 %v6167_v32 }
 0x325   : > { %6170 = vmatpush3.bf16.msra.mxu1 %v6167_v32  ;;  %v6203_v32 = vpack.c.bf16 %v2651_v31, %v2650_v30  ;;  %v6232_v30 = vpack.c.bf16 %v3546_v28, %v3545_v27  ;;  %v3547_v31 = vld [vmem:[%s7878_s8 + $0x80] sm:$0xff] }
 0x326   : > { %6172 = vmatprep.subr.bf16.mxu1 %v6171_v33 }
 0x328   : > { %5724 = vmatmul.mubr.msk.f32.vlgmr.msra.gmra.mrb[8].mxu1 %vm2424_vm2, %v2407_v34  ;;  %v3396_v34 = vld [vmem:[%s7876_s6] sm:$0x7] }
 0x329   : > { %5726 = vmatprep.mubr.msk.f32.mxu1 %vm2424_vm2, %v2408_v37  ;;  %6174 = vmatpush3.bf16.msra.mxu1 %v6171_v33  ;;  %v6477_v33 = vmov 0.0   ;;  %v3400_v37 = vrot.slane %v3396_v34, %v7201_v36 }
 0x32a   : > { %6176 = vmatprep.subr.bf16.mxu1 %v6175_v57  ;;  %5990 = vmatprep.mubr.msk.f32.mxu0 %vm6476_vm12, %v6477_v33 }
 0x32c   : > { %5727 = vmatmul.mubr.msk.f32.gmra.mrb[10].mxu1 %vm2424_vm2, %v2409_v38 }
 0x32d   : > { %5729 = vmatprep.mubr.msk.f32.mxu1 %vm2424_vm2, %v2410_v41 }
 0x330   : > { %5730 = vmatmul.mubr.msk.f32.gmra.mrb[12].mxu1 %vm2424_vm2, %v2411_v42 }
 0x331   : > { %5732 = vmatprep.mubr.msk.f32.mxu1 %vm2424_vm2, %v2412_v44  ;;  %v3412_v44 = vrot.slane %v3396_v34, %v7207_v40 }
 0x334   : > { %5733 = vmatmul.mubr.msk.f32.gmra.mrb[14].mxu1 %vm2424_vm2, %v2413_v45 }
 0x335   : > { %5735 = vmatprep.mubr.msk.f32.mxu1 %vm2424_vm2, %v2414_v39 }
 0x338   : > { %5736 = vmatmul.mubr.msk.f32.gmra.mrb[16].mxu1 %vm2424_vm2, %v2415_v43  ;;  %v3418_v43 = vrot.slane %v3396_v34, %v7209_v35 }
 0x339   : > { %5738 = vmatprep.mubr.msk.f32.mxu1 %vm2424_vm2, %v2416_v46 }
 0x33c   : > { %5739 = vmatmul.mubr.msk.f32.gmra.mrb[18].mxu1 %vm2424_vm2, %v2417_v49 }
 0x33d   : > { %5741 = vmatprep.mubr.msk.f32.mxu1 %vm2424_vm2, %v2418_v50 }
 0x340   : > { %5742 = vmatmul.mubr.msk.f32.gmra.mrb[20].mxu1 %vm2424_vm2, %v2419_v47 }
 0x341   : > { %5744 = vmatprep.mubr.msk.f32.mxu1 %vm2424_vm2, %v2420_v51 }
 0x344   : > { %5745 = vmatmul.mubr.msk.f32.gmra.mrb[22].mxu1 %vm2424_vm2, %v2421_v52 }
 0x345   : > { %5747 = vmatprep.mubr.msk.f32.mxu1 %vm2424_vm2, %v2422_v53 }
 0x348   : > { %5748 = vmatmul.mubr.msk.f32.gmra.mrb[24].mxu1 %vm2424_vm2, %v2423_v54  ;;  %v3535_v54 = vld [vmem:[%s7878_s8 + $0x20] sm:$0xff] }
 0x3fb   : > { %v5725_v58 = vpop.f32.mrb[8].mxu1 }
 0x3fc   : > { %v2545_v59 = vpop.f32.mrb[9].mxu1 }
 0x3ff   : > { %v5728_v62 = vpop.f32.mrb[10].mxu1 }
 0x400   : > { %v2555_v63 = vpop.f32.mrb[11].mxu1 }
 0x401   : > { %5754 = vmatprep.mubr.msk.f32.mxu1 %vm2652_vm11, %v2555_v63  ;;  %v3423_v63 = vld [vmem:[%s7877_s7 + $0x10] sm:$0xff] }
 0x402   : > { %5755 = vmatmul.mubr.msk.f32.vlgmr.msra.gmra.mrb[26].mxu1 %vm2652_vm11, %v5728_v62 }
 0x403   : > { %5761 = vmatprep.mubr.msk.f32.mxu1 %vm2652_vm11, %v2545_v59  ;;  %6178 = vmatpush3.bf16.msra.mxu1 %v6175_v57  ;;  %v5731_v1 = vpop.f32.mrb[12].mxu1  ;;  %v3421_v57 = vld [vmem:[%s7877_s7] sm:$0xff]  ;;  %v3537_v59 = vld [vmem:[%s7878_s8 + $0x30] sm:$0xff] }
 0x404   : > { %6180 = vmatprep.subr.bf16.mxu1 %v6179_v0  ;;  %v2565_v3 = vpop.f32.mrb[13].mxu1  ;;  %v6214_v62 = vpack.c.bf16 %v3538_v60, %v3537_v59  ;;  %v3561_v59 = vld [vmem:[%s7878_s8 + $0xf0] sm:$0xff]  ;;  %v3562_v60 = vld [vmem:[%s7878_s8 + $0xf8] sm:$0xff] }
 0x407   : > { %v5734_v6 = vpop.f32.mrb[14].mxu1 }
 0x408   : > { %v2575_v8 = vpop.f32.mrb[15].mxu1 }
 0x40a   : > { %5762 = vmatmul.mubr.msk.f32.vlgmr.msra.gmra.mrb[26].mxu1 %vm2652_vm11, %v5725_v58  ;;  %v6211_v58 = vpack.c.bf16 %v3536_v55, %v3535_v54  ;;  %v3558_v54 = vld [vmem:[%s7878_s8 + $0xd8] sm:$0xff] }
 0x40b   : > { %6182 = vmatpush3.bf16.msra.mxu1 %v6179_v0  ;;  %5768 = vmatprep.mubr.msk.f32.mxu1 %vm2652_vm11, %v2565_v3  ;;  %v5737_v9 = vpop.f32.mrb[16].mxu1  ;;  %v3424_v0 = vld [vmem:[%s7877_s7 + $0x18] sm:$0xff]  ;;  %v3531_v3 = vld [vmem:[%s7878_s8] sm:$0xff] }
 0x40c   : > { %6184 = vmatprep.subr.bf16.mxu1 %v6183_v7  ;;  %v2585_v10 = vpop.f32.mrb[17].mxu1 }
 0x40f   : > { %v5740_v13 = vpop.f32.mrb[18].mxu1 }
 0x410   : > { %v2595_v15 = vpop.f32.mrb[19].mxu1 }
 0x412   : > { %5769 = vmatmul.mubr.msk.f32.vlgmr.msra.gmra.mrb[26].mxu1 %vm2652_vm11, %v5731_v1  ;;  %v3425_v1 = vld [vmem:[%s7877_s7 + $0x20] sm:$0xf] }
 0x413   : > { %6186 = vmatpush3.bf16.msra.mxu1 %v6183_v7  ;;  %5775 = vmatprep.mubr.msk.f32.mxu1 %vm2652_vm11, %v2575_v8  ;;  %v5743_v16 = vpop.f32.mrb[20].mxu1 }
 0x414   : > { %6188 = vmatprep.subr.bf16.mxu1 %v6187_v14  ;;  %v2605_v48 = vpop.f32.mrb[21].mxu1 }
 0x417   : > { %v5746_v19 = vpop.f32.mrb[22].mxu1 }
 0x418   : > { %v2615_v21 = vpop.f32.mrb[23].mxu1 }
 0x41a   : > { %5776 = vmatmul.mubr.msk.f32.vlgmr.msra.gmra.mrb[26].mxu1 %vm2652_vm11, %v5734_v6  ;;  %v6217_v6 = vpack.c.bf16 %v3532_v4, %v3531_v3  ;;  %v3565_v3 = vld [vmem:[%s7878_s8 + $0x110] sm:$0xff]  ;;  %v3566_v4 = vld [vmem:[%s7878_s8 + $0x118] sm:$0xff] }
 0x41b   : > { %6190 = vmatpush3.bf16.msra.mxu1 %v6187_v14  ;;  %5782 = vmatprep.mubr.msk.f32.mxu1 %vm2652_vm11, %v2585_v10  ;;  %v5749_v22 = vpop.f32.mrb[24].mxu1  ;;  %v3534_v10 = vld [vmem:[%s7878_s8 + $0x18] sm:$0xff]  ;;  %v3540_v14 = vld [vmem:[%s7878_s8 + $0x48] sm:$0xff] }
 0x41c   : > { %6192 = vmatprep.subr.bf16.mxu1 %v6191_v20  ;;  %v2625_v23 = vpop.f32.mrb[25].mxu1 }
 0x422   : > { %5783 = vmatmul.mubr.msk.f32.vlgmr.msra.gmra.mrb[26].mxu1 %vm2652_vm11, %v5737_v9  ;;  %v3533_v9 = vld [vmem:[%s7878_s8 + $0x10] sm:$0xff] }
 0x423   : > { %6194 = vmatpush3.bf16.msra.mxu1 %v6191_v20  ;;  %5789 = vmatprep.mubr.msk.f32.mxu1 %vm2652_vm11, %v2595_v15  ;;  %v6220_v11 = vpack.c.bf16 %v3534_v10, %v3533_v9  ;;  %v6226_v20 = vpack.c.bf16 %v3542_v18, %v3541_v17  ;;  %v4251_v9 = vld [vmem:[%s7880_s10] sm:$0xff]  ;;  %v4355_v10 = vld [vmem:[%s7881_s11 + $0x90] sm:$0xff] }
 0x424   : > { %6196 = vmatprep.subr.bf16.mxu1 %v6195_v26 }
 0x42a   : > { %5790 = vmatmul.mubr.msk.f32.vlgmr.msra.gmra.mrb[26].mxu1 %vm2652_vm11, %v5740_v13  ;;  %v3539_v13 = vld [vmem:[%s7878_s8 + $0x40] sm:$0xff] }
 0x42b   : > { %6198 = vmatpush3.bf16.msra.mxu1 %v6195_v26  ;;  %5796 = vmatprep.mubr.msk.f32.mxu1 %vm2652_vm11, %v2605_v48 }
 0x42c   : > { %6200 = vmatprep.subr.bf16.mxu1 %v6199_v29 }
 0x432   : > { %5797 = vmatmul.mubr.msk.f32.vlgmr.msra.gmra.mrb[26].mxu1 %vm2652_vm11, %v5743_v16  ;;  %v6223_v16 = vpack.c.bf16 %v3540_v14, %v3539_v13  ;;  %v4358_v14 = vld [vmem:[%s7881_s11 + $0xa8] sm:$0xff] }
 0x433   : > { %6202 = vmatpush3.bf16.msra.mxu1 %v6199_v29  ;;  %5803 = vmatprep.mubr.msk.f32.mxu1 %vm2652_vm11, %v2615_v21 }
 0x434   : > { %6204 = vmatprep.subr.bf16.mxu1 %v6203_v32 }
 0x43a   : > { %5804 = vmatmul.mubr.msk.f32.vlgmr.msra.gmra.mrb[26].mxu1 %vm2652_vm11, %v5746_v19 }
 0x43b   : > { %6206 = vmatpush3.bf16.msra.mxu1 %v6203_v32  ;;  %5810 = vmatprep.mubr.msk.f32.mxu1 %vm2652_vm11, %v2625_v23  ;;  %v3544_v23 = vld [vmem:[%s7878_s8 + $0x68] sm:$0xff] }
 0x43c   : > { %6207 = vmatprep.subr.bf16.mxu1 %v6475_v2  ;;  %v3548_v32 = vld [vmem:[%s7878_s8 + $0x88] sm:$0xff] }
 0x43d   : > { %v6235_v34 = vpack.c.bf16 %v3548_v32, %v3547_v31 }
 0x442   : > { %5811 = vmatmul.mubr.msk.f32.vlgmr.msra.gmra.mrb[26].mxu1 %vm2652_vm11, %v5749_v22  ;;  %v3543_v22 = vld [vmem:[%s7878_s8 + $0x60] sm:$0xff] }
 0x443   : > { %5817 = vmatprep.mubr.msk.f32.mxu1 %vm6476_vm12, %v6477_v33  ;;  %v6229_v25 = vpack.c.bf16 %v3544_v23, %v3543_v22 }
 0x515   : > { %v5812_v38 = vpop.f32.mrb[26].mxu1 }
 0x516   : > { %v3402_v41 = vadd.f32 %v5812_v38, %v3400_v37  ;;  %v3385_v42 = vpop.f32.mrb[27].mxu1  ;;  %v3549_v38 = vld [vmem:[%s7878_s8 + $0x90] sm:$0xff] }
 0x517   : > { %v3401_v45 = vadd.f32 %v3400_v37, %v3385_v42 }
 0x518   : > { %vm3404_vm13 = vcmp.ge.f32.partialorder %v3402_v41, 0.0  ;;  %v3406_v39 = vmul.f32 0.2, %v3402_v41 }
 0x519   : > { %vm3403_vm14 = vcmp.ge.f32.partialorder %v3401_v45, 0.0  ;;  %v3405_v46 = vmul.f32 0.2, %v3401_v45 }
 0x51a   : > { %v3408_v49 = vsel %vm3404_vm13, %v3402_v41, %v3406_v39  ;;  %v3550_v41 = vld [vmem:[%s7878_s8 + $0x98] sm:$0xff] }
 0x51b   : > { %v3414_v50 = vmul.f32 %v3412_v44, %v3408_v49  ;;  %v3407_v47 = vsel %vm3403_vm14, %v3401_v45, %v3405_v46  ;;  %v6238_v42 = vpack.c.bf16 %v3550_v41, %v3549_v38  ;;  %v3552_v45 = vld [vmem:[%s7878_s8 + $0xa8] sm:$0xff]  ;;  %v3554_v46 = vld [vmem:[%s7878_s8 + $0xb8] sm:$0xff] }
 0x51c   : > { %v3413_v51 = vmul.f32 %v3412_v44, %v3407_v47  ;;  %v3551_v44 = vld [vmem:[%s7878_s8 + $0xa0] sm:$0xff]  ;;  %v3556_v47 = vld [vmem:[%s7878_s8 + $0xc8] sm:$0xff] }
 0x51d   : > { %v3420_v52 = vadd.f32 %v3418_v43, %v3414_v50  ;;  %v6241_v39 = vpack.c.bf16 %v3552_v45, %v3551_v44  ;;  %v3555_v50 = vld [vmem:[%s7878_s8 + $0xc0] sm:$0xff] }
 0x51e   : > { %v3419_v53 = vadd.f32 %v3418_v43, %v3413_v51  ;;  %v3553_v43 = vld [vmem:[%s7878_s8 + $0xb0] sm:$0xff]  ;;  %v6247_v51 = vpack.c.bf16 %v3556_v47, %v3555_v50 }
 0x51f   : > { %v6244_v49 = vpack.c.bf16 %v3554_v46, %v3553_v43  ;;  %v4232_v43 = vld [vmem:[%s7879_s9] sm:$0x7] }
 0x520   : > { %v6208_v56 = vpack.c.bf16 %v3420_v52, %v3419_v53  ;;  %v3557_v53 = vld [vmem:[%s7878_s8 + $0xd0] sm:$0xff]  ;;  %v4236_v46 = vrot.slane %v4232_v43, %v7201_v36  ;;  %v4346_v36 = vld [vmem:[%s7881_s11 + $0x48] sm:$0xff] }
 0x521   : > { %v6250_v55 = vpack.c.bf16 %v3558_v54, %v3557_v53  ;;  %v4249_v54 = vrot.slane %v4232_v43, %v7209_v35  ;;  %v4347_v35 = vld [vmem:[%s7881_s11 + $0x50] sm:$0xff] }
 0x522   : > { %6209 = vmatpush3.bf16.msra.mxu1 %v6208_v56  ;;  %v3559_v56 = vld [vmem:[%s7878_s8 + $0xe0] sm:$0xff] }
 0x523   : > { %6210 = vmatprep.subr.bf16.mxu1 %v6475_v2 }
 0x525   : > { %5818 = vmatmul.mubr.msk.f32.vlgmr.msra.gmra.mrb[28].mxu1 %vm2652_vm11, %v3421_v57  ;;  %v3560_v57 = vld [vmem:[%s7878_s8 + $0xe8] sm:$0xff] }
 0x526   : > { %5820 = vmatprep.mubr.msk.f32.mxu1 %vm6476_vm12, %v6477_v33  ;;  %6212 = vmatpush3.bf16.msra.mxu1 %v6211_v58  ;;  %v6253_v58 = vpack.c.bf16 %v3560_v57, %v3559_v56  ;;  %v4345_v57 = vld [vmem:[%s7881_s11 + $0x40] sm:$0xff] }
 0x527   : > { %6213 = vmatprep.subr.bf16.mxu1 %v6475_v2 }
 0x529   : > { %5821 = vmatmul.mubr.msk.f32.gmra.mrb[30].mxu1 %vm2652_vm11, %v3422_v61  ;;  %v6256_v61 = vpack.c.bf16 %v3562_v60, %v3561_v59  ;;  %v4252_v59 = vld [vmem:[%s7880_s10 + $0x8] sm:$0x1]  ;;  %v4348_v60 = vld [vmem:[%s7881_s11 + $0x58] sm:$0xff] }
 0x52a   : > { %5823 = vmatprep.mubr.msk.f32.mxu1 %vm6476_vm12, %v6477_v33  ;;  %6215 = vmatpush3.bf16.msra.mxu1 %v6214_v62  ;;  %v3563_v62 = vld [vmem:[%s7878_s8 + $0x100] sm:$0xff] }
 0x52b   : > { %6216 = vmatprep.subr.bf16.mxu1 %v6475_v2 }
 0x52d   : > { %5824 = vmatmul.mubr.msk.f32.gmra.mrb[32].mxu1 %vm2652_vm11, %v3423_v63  ;;  %v3564_v63 = vld [vmem:[%s7878_s8 + $0x108] sm:$0xff] }
 0x52e   : > { %5826 = vmatprep.mubr.msk.f32.mxu1 %vm6476_vm12, %v6477_v33 }
 0x531   : > { %5827 = vmatmul.mubr.msk.f32.gmra.mrb[34].mxu1 %vm2652_vm11, %v3424_v0  ;;  %v6259_v0 = vpack.c.bf16 %v3564_v63, %v3563_v62  ;;  %v4349_v62 = vld [vmem:[%s7881_s11 + $0x60] sm:$0xff]  ;;  %v4350_v63 = vld [vmem:[%s7881_s11 + $0x68] sm:$0xff] }
 0x532   : > { %5829 = vmatprep.mubr.msk.f32.mxu1 %vm6476_vm12, %v6477_v33 }
 0x535   : > { %5830 = vmatmul.mubr.msk.f32.gmra.mrb[36].mxu1 %vm2652_vm11, %v3425_v1 }
 0x536   : > { %5840 = vmatprep.mubr.msk.f32.mxu1 %vm6476_vm12, %v6477_v33 }
 0x5f8   : > { %v3507_v5 = vpop.f32.mrb[28].mxu1 }
 0x5f9   : > { %v3568_v7 = vrot.slane %v3507_v5, 4  ;;  %v5819_v8 = vpop.f32.mrb[29].mxu1 }
 0x5fb   : > { %5841 = vmatmul.mubr.msk.f32.vlgmr.msra.gmra.mrb[38].mxu1 %vm3569_vm15, %v3568_v7  ;;  %v4354_v7 = vld [vmem:[%s7881_s11 + $0x88] sm:$0xff] }
 0x5fc   : > { %6218 = vmatpush3.bf16.msra.mxu1 %v6217_v6  ;;  %5851 = vmatprep.mubr.msk.f32.mxu1 %vm6476_vm12, %v6477_v33  ;;  %v3512_v12 = vpop.f32.mrb[30].mxu1  ;;  %v4353_v6 = vld [vmem:[%s7881_s11 + $0x80] sm:$0xff] }
 0x5fd   : > { %6219 = vmatprep.subr.bf16.mxu1 %v6475_v2  ;;  %v5822_v15 = vpop.f32.mrb[31].mxu1  ;;  %v3788_v37 = vrot.slane %v3512_v12, 4  ;;  %v6289_v8 = vpack.c.bf16 %v4354_v7, %v4353_v6  ;;  %v4338_v6 = vld [vmem:[%s7881_s11 + $0x8] sm:$0xff]  ;;  %v4369_v7 = vld [vmem:[%s7881_s11 + $0x100] sm:$0xff] }
 0x5ff   : > { %6290 = vmatpush3.bf16.msra.mxu0 %v6289_v8  ;;  %v4370_v8 = vld [vmem:[%s7881_s11 + $0x108] sm:$0xff] }
 0x600   : > { %6221 = vmatpush3.bf16.msra.mxu1 %v6220_v11  ;;  %v3517_v48 = vpop.f32.mrb[32].mxu1  ;;  %6291 = vmatprep.subr.bf16.mxu0 %v6475_v2  ;;  %v4356_v11 = vld [vmem:[%s7881_s11 + $0x98] sm:$0xff] }
 0x601   : > { %6222 = vmatprep.subr.bf16.mxu1 %v6475_v2  ;;  %v5825_v19 = vpop.f32.mrb[33].mxu1  ;;  %v3936_v52 = vrot.slane %v3517_v48, 4  ;;  %v6292_v13 = vpack.c.bf16 %v4356_v11, %v4355_v10 }
 0x603   : > { %5852 = vmatmul.mubr.msk.f32.vlgmr.msra.gmra.mrb[40].mxu1 %vm3569_vm15, %v3507_v5  ;;  %v6262_v5 = vpack.c.bf16 %v3566_v4, %v3565_v3  ;;  %6293 = vmatpush3.bf16.msra.mxu0 %v6292_v13  ;;  %v4352_v3 = vld [vmem:[%s7881_s11 + $0x78] sm:$0xff]  ;;  %v4339_v13 = vld [vmem:[%s7881_s11 + $0x10] sm:$0xff] }
 0x604   : > { %6224 = vmatpush3.bf16.msra.mxu1 %v6223_v16  ;;  %5862 = vmatprep.mubr.msk.f32.mxu1 %vm6476_vm12, %v6477_v33  ;;  %v7441_v21 = vpop.f32.mrb[34].mxu1  ;;  %v4359_v16 = vld [vmem:[%s7881_s11 + $0xb0] sm:$0xff] }
 0x605   : > { %6225 = vmatprep.subr.bf16.mxu1 %v6475_v2  ;;  %v5828_v24 = vpop.f32.mrb[35].mxu1  ;;  %v4084_v1 = vrot.slane %v7441_v21, 4  ;;  %6294 = vmatprep.subr.bf16.mxu0 %v6475_v2 }
 0x608   : > { %6227 = vmatpush3.bf16.msra.mxu1 %v6226_v20  ;;  %v7450_v26 = vpop.f32.mrb[36].mxu1 }
 0x609   : > { %6228 = vmatprep.subr.bf16.mxu1 %v6475_v2  ;;  %v5831_v29 = vpop.f32.mrb[37].mxu1 }
 0x60b   : > { %5863 = vmatmul.mubr.msk.f32.vlgmr.msra.gmra.mrb[42].mxu1 %vm3569_vm15, %v3512_v12  ;;  %v4357_v12 = vld [vmem:[%s7881_s11 + $0xa0] sm:$0xff] }
 0x60c   : > { %6230 = vmatpush3.bf16.msra.mxu1 %v6229_v25  ;;  %5873 = vmatprep.mubr.msk.f32.mxu1 %vm6476_vm12, %v6477_v33  ;;  %v6295_v15 = vpack.c.bf16 %v4358_v14, %v4357_v12  ;;  %v6313_v12 = vpack.c.bf16 %v4370_v8, %v4369_v7  ;;  %v4404_v7 = vld [vmem:[%s7881_s11 + $0x218] sm:$0xff] }
 0x60d   : > { %6231 = vmatprep.subr.bf16.mxu1 %v6475_v2 }
 0x60e   : > { %6296 = vmatpush3.bf16.msra.mxu0 %v6295_v15 }
 0x60f   : > { %6297 = vmatprep.subr.bf16.mxu0 %v6475_v2 }
 0x610   : > { %6233 = vmatpush3.bf16.msra.mxu1 %v6232_v30 }
 0x611   : > { %6234 = vmatprep.subr.bf16.mxu1 %v6475_v2 }
 0x613   : > { %5874 = vmatmul.mubr.msk.f32.vlgmr.msra.gmra.mrb[44].mxu1 %vm3569_vm15, %v3788_v37 }
 0x614   : > { %6236 = vmatpush3.bf16.msra.mxu1 %v6235_v34  ;;  %5884 = vmatprep.mubr.msk.f32.mxu1 %vm6476_vm12, %v6477_v33 }
 0x615   : > { %6237 = vmatprep.subr.bf16.mxu1 %v6475_v2 }
 0x618   : > { %6239 = vmatpush3.bf16.msra.mxu1 %v6238_v42 }
 0x619   : > { %6240 = vmatprep.subr.bf16.mxu1 %v6475_v2 }
 0x61b   : > { %5885 = vmatmul.mubr.msk.f32.vlgmr.msra.gmra.mrb[46].mxu1 %vm3569_vm15, %v3517_v48  ;;  %v4360_v48 = vld [vmem:[%s7881_s11 + $0xb8] sm:$0xff] }
 0x61c   : > { %6242 = vmatpush3.bf16.msra.mxu1 %v6241_v39  ;;  %5895 = vmatprep.mubr.msk.f32.mxu1 %vm6476_vm12, %v6477_v33  ;;  %v6298_v17 = vpack.c.bf16 %v4360_v48, %v4359_v16  ;;  %v4340_v16 = vld [vmem:[%s7881_s11 + $0x18] sm:$0xff]  ;;  %v4371_v48 = vld [vmem:[%s7881_s11 + $0x110] sm:$0xff] }
 0x61d   : > { %6243 = vmatprep.subr.bf16.mxu1 %v6475_v2 }
 0x61e   : > { %6299 = vmatpush3.bf16.msra.mxu0 %v6298_v17  ;;  %v4372_v17 = vld [vmem:[%s7881_s11 + $0x118] sm:$0xff] }
 0x61f   : > { %6312 = vmatprep.subr.bf16.mxu0 %v6475_v2 }
 0x620   : > { %6245 = vmatpush3.bf16.msra.mxu1 %v6244_v49 }
 0x621   : > { %6246 = vmatprep.subr.bf16.mxu1 %v6475_v2 }
 0x623   : > { %5896 = vmatmul.mubr.msk.f32.vlgmr.msra.gmra.mrb[48].mxu1 %vm3569_vm15, %v3936_v52  ;;  %v4244_v52 = vrot.slane %v4232_v43, %v7207_v40  ;;  %v6265_v40 = vpack.c.bf16 %v4346_v36, %v4345_v57  ;;  %v4387_v43 = vld [vmem:[%s7881_s11 + $0x190] sm:$0xff]  ;;  %v4368_v57 = vld [vmem:[%s7881_s11 + $0xf8] sm:$0xff] }
 0x624   : > { %6248 = vmatpush3.bf16.msra.mxu1 %v6247_v51  ;;  %5906 = vmatprep.mubr.msk.f32.mxu1 %vm6476_vm12, %v6477_v33  ;;  %v4391_v36 = vld [vmem:[%s7881_s11 + $0x1b0] sm:$0xff] }
 0x625   : > { %6249 = vmatprep.subr.bf16.mxu1 %v6475_v2 }
 0x628   : > { %6251 = vmatpush3.bf16.msra.mxu1 %v6250_v55 }
 0x629   : > { %6252 = vmatprep.subr.bf16.mxu1 %v6475_v2 }
 0x62b   : > { %5907 = vmatmul.mubr.msk.f32.vlgmr.msra.gmra.mrb[50].mxu1 %vm3569_vm15, %v7441_v21 }
 0x62c   : > { %6254 = vmatpush3.bf16.msra.mxu1 %v6253_v58  ;;  %5917 = vmatprep.mubr.msk.f32.mxu1 %vm6476_vm12, %v6477_v33 }
 0x62d   : > { %6255 = vmatprep.subr.bf16.mxu1 %v6475_v2 }
 0x630   : > { %6257 = vmatpush3.bf16.msra.mxu1 %v6256_v61  ;;  %v6268_v61 = vpack.c.bf16 %v4348_v60, %v4347_v35  ;;  %v4377_v35 = vld [vmem:[%s7881_s11 + $0x140] sm:$0xff]  ;;  %v4378_v60 = vld [vmem:[%s7881_s11 + $0x148] sm:$0xff] }
 0x631   : > { %6258 = vmatprep.subr.bf16.mxu1 %v6475_v2 }
 0x633   : > { %5918 = vmatmul.mubr.msk.f32.vlgmr.msra.gmra.mrb[52].mxu1 %vm3569_vm15, %v4084_v1  ;;  %v4351_v1 = vld [vmem:[%s7881_s11 + $0x70] sm:$0xff] }
 0x634   : > { %6260 = vmatpush3.bf16.msra.mxu1 %v6259_v0  ;;  %5928 = vmatprep.mubr.msk.f32.mxu1 %vm6476_vm12, %v6477_v33  ;;  %v6271_v0 = vpack.c.bf16 %v4350_v63, %v4349_v62  ;;  %v6274_v4 = vpack.c.bf16 %v4352_v3, %v4351_v1  ;;  %v4402_v62 = vld [vmem:[%s7881_s11 + $0x208] sm:$0xff]  ;;  %v6325_v63 = vpack.c.bf16 %v4378_v60, %v4377_v35  ;;  %v4379_v1 = vld [vmem:[%s7881_s11 + $0x150] sm:$0xff]  ;;  %v5073_v60 = vld [vmem:[%s7882_s12] sm:$0x7] }
 0x635   : > { %6261 = vmatprep.subr.bf16.mxu1 %v6475_v2 }
 0x638   : > { %6263 = vmatpush3.bf16.msra.mxu1 %v6262_v5  ;;  %v4337_v5 = vld [vmem:[%s7881_s11] sm:$0xff] }
 0x639   : > { %v6277_v11 = vpack.c.bf16 %v4338_v6, %v4337_v5  ;;  %v4380_v5 = vld [vmem:[%s7881_s11 + $0x158] sm:$0xff]  ;;  %v4403_v6 = vld [vmem:[%s7881_s11 + $0x210] sm:$0xff] }
 0x63a   : > { %v6328_v8 = vpack.c.bf16 %v4380_v5, %v4379_v1  ;;  %v5082_v1 = vrot.slane %v5073_v60, 2  ;;  %v5085_v5 = vld [vmem:[%s7883_s13] sm:$0x1] }
 0x63b   : > { %5929 = vmatmul.mubr.msk.f32.vlgmr.msra.gmra.mrb[54].mxu1 %vm3569_vm15, %v7450_v26 }
 0x63c   : > { %5933 = vmatprep.mubr.msk.f32.mxu1 %vm1101_vm1, %v4251_v9 }
 0x6ce   : > { %v3638_v18 = vpop.f32.mrb[38].mxu1 }
 0x6cf   : > { %v5842_v19 = vpop.f32.mrb[39].mxu1 }
 0x6d0   : > { %v6316_v19 = vpack.c.bf16 %v4372_v17, %v4371_v48  ;;  %v4383_v17 = vld [vmem:[%s7881_s11 + $0x170] sm:$0xff] }
 0x6d6   : > { %v3710_v20 = vpop.f32.mrb[40].mxu1 }
 0x6d7   : > { %v3711_v21 = vadd.f32 %v3710_v20, %v3638_v18  ;;  %v5853_v22 = vpop.f32.mrb[41].mxu1  ;;  %v6280_v18 = vpack.c.bf16 %v4340_v16, %v4339_v13  ;;  %v4341_v20 = vld [vmem:[%s7881_s11 + $0x20] sm:$0xff]  ;;  %v4382_v13 = vld [vmem:[%s7881_s11 + $0x168] sm:$0xff] }
 0x6d8   : > { %v4373_v22 = vld [vmem:[%s7881_s11 + $0x120] sm:$0xff] }
 0x6de   : > { %v3783_v23 = vpop.f32.mrb[42].mxu1 }
 0x6df   : > { %v3787_v24 = vadd.f32 %v3783_v23, %v3711_v21  ;;  %v5864_v25 = vpop.f32.mrb[43].mxu1  ;;  %v4342_v21 = vld [vmem:[%s7881_s11 + $0x28] sm:$0xff] }
 0x6e0   : > { %v4374_v23 = vld [vmem:[%s7881_s11 + $0x128] sm:$0xff] }
 0x6e1   : > { %v6319_v25 = vpack.c.bf16 %v4374_v23, %v4373_v22  ;;  %v4393_v23 = vld [vmem:[%s7881_s11 + $0x1c0] sm:$0xff] }
 0x6e6   : > { %v3857_v26 = vpop.f32.mrb[44].mxu1 }
 0x6e7   : > { %v3861_v27 = vadd.f32 %v3857_v26, %v3787_v24  ;;  %v5875_v28 = vpop.f32.mrb[45].mxu1  ;;  %v6283_v24 = vpack.c.bf16 %v4342_v21, %v4341_v20  ;;  %v4343_v26 = vld [vmem:[%s7881_s11 + $0x30] sm:$0xff]  ;;  %v4408_v20 = vld [vmem:[%s7881_s11 + $0x238] sm:$0xff] }
 0x6e8   : > { %v4375_v28 = vld [vmem:[%s7881_s11 + $0x130] sm:$0xff] }
 0x6ee   : > { %v3931_v29 = vpop.f32.mrb[46].mxu1 }
 0x6ef   : > { %v3935_v30 = vadd.f32 %v3931_v29, %v3861_v27  ;;  %v5886_v31 = vpop.f32.mrb[47].mxu1  ;;  %v4344_v27 = vld [vmem:[%s7881_s11 + $0x38] sm:$0xff] }
 0x6f0   : > { %v4376_v29 = vld [vmem:[%s7881_s11 + $0x138] sm:$0xff] }
 0x6f1   : > { %v6322_v31 = vpack.c.bf16 %v4376_v29, %v4375_v28  ;;  %v4396_v28 = vld [vmem:[%s7881_s11 + $0x1d8] sm:$0xff] }
 0x6f6   : > { %v4005_v32 = vpop.f32.mrb[48].mxu1 }
 0x6f7   : > { %v4009_v34 = vadd.f32 %v4005_v32, %v3935_v30  ;;  %v5897_v37 = vpop.f32.mrb[49].mxu1  ;;  %v6286_v30 = vpack.c.bf16 %v4344_v27, %v4343_v26  ;;  %v4361_v32 = vld [vmem:[%s7881_s11 + $0xc0] sm:$0xff]  ;;  %v4395_v27 = vld [vmem:[%s7881_s11 + $0x1d0] sm:$0xff] }
 0x6f8   : > { %v4385_v37 = vld [vmem:[%s7881_s11 + $0x180] sm:$0xff]  ;;  %v6352_v29 = vpack.c.bf16 %v4396_v28, %v4395_v27 }
 0x6fe   : > { %v4079_v38 = vpop.f32.mrb[50].mxu1 }
 0x6ff   : > { %v4083_v41 = vadd.f32 %v4079_v38, %v4009_v34  ;;  %v5908_v42 = vpop.f32.mrb[51].mxu1  ;;  %v4362_v34 = vld [vmem:[%s7881_s11 + $0xc8] sm:$0xff] }
 0x700   : > { %v4386_v38 = vld [vmem:[%s7881_s11 + $0x188] sm:$0xff] }
 0x701   : > { %v6337_v42 = vpack.c.bf16 %v4386_v38, %v4385_v37 }
 0x706   : > { %v4153_v44 = vpop.f32.mrb[52].mxu1 }
 0x707   : > { %v4157_v45 = vadd.f32 %v4153_v44, %v4083_v41  ;;  %v5919_v39 = vpop.f32.mrb[53].mxu1  ;;  %v6301_v41 = vpack.c.bf16 %v4362_v34, %v4361_v32  ;;  %v4363_v44 = vld [vmem:[%s7881_s11 + $0xd0] sm:$0xff] }
 0x708   : > { %v4364_v39 = vld [vmem:[%s7881_s11 + $0xd8] sm:$0xff] }
 0x70e   : > { %v4227_v49 = vpop.f32.mrb[54].mxu1 }
 0x70f   : > { %v4231_v50 = vadd.f32 %v4227_v49, %v4157_v45  ;;  %v5930_v47 = vpop.f32.mrb[55].mxu1  ;;  %v6304_v49 = vpack.c.bf16 %v4364_v39, %v4363_v44 }
 0x710   : > { %v4365_v47 = vld [vmem:[%s7881_s11 + $0xe0] sm:$0xff] }
 0x711   : > { %v4237_v51 = vadd.f32 %v4236_v46, %v4231_v50  ;;  %v4388_v46 = vld [vmem:[%s7881_s11 + $0x198] sm:$0xff] }
 0x712   : > { %v6340_v50 = vpack.c.bf16 %v4388_v46, %v4387_v43 }
 0x713   : > { %vm4238_vm3 = vcmp.ge.f32.partialorder %v4237_v51, 0.0  ;;  %v4239_v53 = vmul.f32 0.2, %v4237_v51 }
 0x715   : > { %v4240_v55 = vsel %vm4238_vm3, %v4237_v51, %v4239_v53  ;;  %v4366_v51 = vld [vmem:[%s7881_s11 + $0xe8] sm:$0xff] }
 0x716   : > { %v4245_v56 = vmul.f32 %v4244_v52, %v4240_v55  ;;  %v4389_v52 = vld [vmem:[%s7881_s11 + $0x1a0] sm:$0xff]  ;;  %v4390_v53 = vld [vmem:[%s7881_s11 + $0x1a8] sm:$0xff] }
 0x717   : > { %v6343_v55 = vpack.c.bf16 %v4390_v53, %v4389_v52 }
 0x718   : > { %v4250_v58 = vadd.f32 %v4249_v54, %v4245_v56  ;;  %v6307_v54 = vpack.c.bf16 %v4366_v51, %v4365_v47  ;;  %v4367_v56 = vld [vmem:[%s7881_s11 + $0xf0] sm:$0xff] }
 0x71a   : > { %5931 = vmatprep.subr.msk.mxu1 %vm1126_vm0, %v4250_v58 }
 0x71b   : > { %5932 = vmatpush3.msk.msra.mxu1 %vm1126_vm0, %v4250_v58  ;;  %v4392_v58 = vld [vmem:[%s7881_s11 + $0x1b8] sm:$0xff] }
 0x71c   : > { %5934 = vmatmul.mubr.msk.f32.vlgmr.msra.gmra.mrb[56].mxu1 %vm1101_vm1, %v4252_v59  ;;  %6264 = vmatprep.subr.bf16.mxu1 %v6475_v2  ;;  %v6310_v59 = vpack.c.bf16 %v4368_v57, %v4367_v56  ;;  %vm5087_vm1 = vcmask 1040384  }
 0x71d   : > { %6266 = vmatpush3.bf16.msra.mxu1 %v6265_v40  ;;  %5952 = vmatprep.mubr.msk.f32.mxu1 %vm6476_vm12, %v6477_v33  ;;  %v6346_v40 = vpack.c.bf16 %v4392_v58, %v4391_v36 }
 0x71e   : > { %6267 = vmatprep.subr.bf16.mxu1 %v6475_v2 }
 0x721   : > { %6269 = vmatpush3.bf16.msra.mxu1 %v6268_v61  ;;  %v4401_v61 = vld [vmem:[%s7881_s11 + $0x200] sm:$0xff] }
 0x722   : > { %6270 = vmatprep.subr.bf16.mxu1 %v6475_v2 }
 0x725   : > { %6272 = vmatpush3.bf16.msra.mxu1 %v6271_v0  ;;  %v6361_v0 = vpack.c.bf16 %v4402_v62, %v4401_v61 }
 0x726   : > { %6273 = vmatprep.subr.bf16.mxu1 %v6475_v2 }
 0x729   : > { %6275 = vmatpush3.bf16.msra.mxu1 %v6274_v4 }
 0x72a   : > { %6276 = vmatprep.subr.bf16.mxu1 %v6475_v2 }
 0x7ef   : > { %v7639_v9 = vpop.f32.mrb[56].mxu1 }
 0x7f0   : > { %v7641_v10 = vpop.f32.mrb[57].mxu1 }
 0x7f1   : > { %v4410_v14 = vrot.slane %v7641_v10, 1  ;;  %v4555_v15 = vrot.slane %v7641_v10, 2  ;;  %v4703_v45 = vrot.slane %v7641_v10, 4  ;;  %v4629_v3 = vrot.slane %v7641_v10, 3 }
 0x7f2   : > { %v4851_v4 = vrot.slane %v7641_v10, 6  ;;  %v4777_v26 = vrot.slane %v7641_v10, 5  ;;  %v4925_v37 = vrot.slane %v7641_v10, 7 }
 0x7f3   : > { %5953 = vmatmul.mubr.msk.f32.vlgmr.msra.gmra.mrb[58].mxu1 %vm2424_vm2, %v4410_v14  ;;  %5991 = vmatmul.mubr.msk.f32.vlgmr.msra.gmra.mrb[144].mxu0 %vm2424_vm2, %v4555_v15  ;;  %v4405_v14 = vld [vmem:[%s7881_s11 + $0x220] sm:$0xff]  ;;  %v4406_v15 = vld [vmem:[%s7881_s11 + $0x228] sm:$0xff] }
 0x7f4   : > { %6278 = vmatpush3.bf16.msra.mxu1 %v6277_v11  ;;  %6314 = vmatpush3.bf16.msra.mxu0 %v6313_v12  ;;  %v6364_v11 = vpack.c.bf16 %v4404_v7, %v4403_v6  ;;  %v4381_v12 = vld [vmem:[%s7881_s11 + $0x160] sm:$0xff]  ;;  %v6367_v48 = vpack.c.bf16 %v4406_v15, %v4405_v14 }
 0x7f5   : > { %6279 = vmatprep.subr.bf16.mxu1 %v6475_v2  ;;  %6315 = vmatprep.subr.bf16.mxu0 %v6475_v2  ;;  %v6331_v16 = vpack.c.bf16 %v4382_v13, %v4381_v12 }
 0x7f6   : > { %5971 = vmatprep.mubr.msk.f32.mxu1 %vm6476_vm12, %v6477_v33  ;;  %6028 = vmatprep.mubr.msk.f32.mxu0 %vm6476_vm12, %v6477_v33 }
 0x7f8   : > { %6281 = vmatpush3.bf16.msra.mxu1 %v6280_v18  ;;  %6317 = vmatpush3.bf16.msra.mxu0 %v6316_v19  ;;  %v4384_v18 = vld [vmem:[%s7881_s11 + $0x178] sm:$0xff]  ;;  %v4407_v19 = vld [vmem:[%s7881_s11 + $0x230] sm:$0xff] }
 0x7f9   : > { %6282 = vmatprep.subr.bf16.mxu1 %v6475_v2  ;;  %6318 = vmatprep.subr.bf16.mxu0 %v6475_v2  ;;  %v6334_v21 = vpack.c.bf16 %v4384_v18, %v4383_v17  ;;  %v6370_v22 = vpack.c.bf16 %v4408_v20, %v4407_v19 }
 0x7fc   : > { %6284 = vmatpush3.bf16.msra.mxu1 %v6283_v24  ;;  %6320 = vmatpush3.bf16.msra.mxu0 %v6319_v25  ;;  %v4394_v24 = vld [vmem:[%s7881_s11 + $0x1c8] sm:$0xff] }
 0x7fd   : > { %6285 = vmatprep.subr.bf16.mxu1 %v6475_v2  ;;  %6321 = vmatprep.subr.bf16.mxu0 %v6475_v2  ;;  %v6349_v25 = vpack.c.bf16 %v4394_v24, %v4393_v23 }
 0x800   : > { %6287 = vmatpush3.bf16.msra.mxu1 %v6286_v30  ;;  %6323 = vmatpush3.bf16.msra.mxu0 %v6322_v31  ;;  %v4397_v30 = vld [vmem:[%s7881_s11 + $0x1e0] sm:$0xff]  ;;  %v4398_v31 = vld [vmem:[%s7881_s11 + $0x1e8] sm:$0xff] }
 0x801   : > { %6300 = vmatprep.subr.bf16.mxu1 %v6475_v2  ;;  %6336 = vmatprep.subr.bf16.mxu0 %v6475_v2  ;;  %v6355_v32 = vpack.c.bf16 %v4398_v31, %v4397_v30 }
 0x803   : > { %5972 = vmatmul.mubr.msk.f32.vlgmr.msra.gmra.mrb[60].mxu1 %vm2424_vm2, %v7641_v10  ;;  %6029 = vmatmul.mubr.msk.f32.vlgmr.msra.gmra.mrb[146].mxu0 %vm2424_vm2, %v4703_v45 }
 0x804   : > { %6302 = vmatpush3.bf16.msra.mxu1 %v6301_v41  ;;  %6338 = vmatpush3.bf16.msra.mxu0 %v6337_v42 }
 0x805   : > { %6303 = vmatprep.subr.bf16.mxu1 %v6475_v2  ;;  %6339 = vmatprep.subr.bf16.mxu0 %v6475_v2 }
 0x806   : > { %6009 = vmatprep.mubr.msk.f32.mxu1 %vm6476_vm12, %v6477_v33  ;;  %6066 = vmatprep.mubr.msk.f32.mxu0 %vm6476_vm12, %v6477_v33 }
 0x808   : > { %6305 = vmatpush3.bf16.msra.mxu1 %v6304_v49  ;;  %6341 = vmatpush3.bf16.msra.mxu0 %v6340_v50 }
 0x809   : > { %6306 = vmatprep.subr.bf16.mxu1 %v6475_v2  ;;  %6342 = vmatprep.subr.bf16.mxu0 %v6475_v2 }
 0x80c   : > { %6308 = vmatpush3.bf16.msra.mxu1 %v6307_v54  ;;  %6344 = vmatpush3.bf16.msra.mxu0 %v6343_v55 }
 0x80d   : > { %6309 = vmatprep.subr.bf16.mxu1 %v6475_v2  ;;  %6345 = vmatprep.subr.bf16.mxu0 %v6475_v2 }
 0x810   : > { %6311 = vmatpush3.bf16.msra.mxu1 %v6310_v59  ;;  %6347 = vmatpush3.bf16.msra.mxu0 %v6346_v40 }
 0x811   : > { %6324 = vmatprep.subr.bf16.mxu1 %v6475_v2  ;;  %6360 = vmatprep.subr.bf16.mxu0 %v6475_v2 }
 0x813   : > { %6010 = vmatmul.mubr.msk.f32.vlgmr.msra.gmra.mrb[62].mxu1 %vm2424_vm2, %v4629_v3  ;;  %6067 = vmatmul.mubr.msk.f32.vlgmr.msra.gmra.mrb[148].mxu0 %vm2424_vm2, %v4851_v4 }
 0x814   : > { %6326 = vmatpush3.bf16.msra.mxu1 %v6325_v63  ;;  %6362 = vmatpush3.bf16.msra.mxu0 %v6361_v0  ;;  %v5079_v63 = vrot.slane %v5073_v60, 1 }
 0x815   : > { %6327 = vmatprep.subr.bf16.mxu1 %v6475_v2  ;;  %6363 = vmatprep.subr.bf16.mxu0 %v6475_v2 }
 0x816   : > { %6047 = vmatprep.mubr.msk.f32.mxu1 %vm6476_vm12, %v6477_v33  ;;  %6104 = vmatprep.mubr.msk.f32.mxu0 %vm6476_vm12, %v6477_v33 }
 0x818   : > { %6329 = vmatpush3.bf16.msra.mxu1 %v6328_v8  ;;  %6365 = vmatpush3.bf16.msra.mxu0 %v6364_v11  ;;  %v5092_v11 = vld [vmem:[#allocation2] sm:$0x1] }
 0x819   : > { %6330 = vmatprep.subr.bf16.mxu1 %v6475_v2  ;;  %6366 = vmatprep.subr.bf16.mxu0 %v6475_v2 }
 0x81c   : > { %6332 = vmatpush3.bf16.msra.mxu1 %v6331_v16  ;;  %6368 = vmatpush3.bf16.msra.mxu0 %v6367_v48 }
 0x81d   : > { %6333 = vmatprep.subr.bf16.mxu1 %v6475_v2  ;;  %6369 = vmatprep.subr.bf16.mxu0 %v6475_v2 }
 0x820   : > { %6335 = vmatpush3.bf16.msra.mxu1 %v6334_v21  ;;  %6371 = vmatpush3.bf16.msra.mxu0 %v6370_v22 }
 0x821   : > { %6348 = vmatprep.subr.bf16.mxu1 %v6475_v2 }
 0x823   : > { %6048 = vmatmul.mubr.msk.f32.vlgmr.msra.gmra.mrb[64].mxu1 %vm2424_vm2, %v4777_v26  ;;  %6105 = vmatmul.mubr.msk.f32.vlgmr.msra.gmra.mrb[150].mxu0 %vm2424_vm2, %v7639_v9  ;;  %v4399_v9 = vld [vmem:[%s7881_s11 + $0x1f0] sm:$0xff] }
 0x824   : > { %6350 = vmatpush3.bf16.msra.mxu1 %v6349_v25  ;;  %6085 = vmatprep.mubr.msk.f32.mxu1 %vm6476_vm12, %v6477_v33  ;;  %v4400_v33 = vld [vmem:[%s7881_s11 + $0x1f8] sm:$0xff] }
 0x825   : > { %6351 = vmatprep.subr.bf16.mxu1 %v6475_v2  ;;  %v6358_v34 = vpack.c.bf16 %v4400_v33, %v4399_v9 }
 0x828   : > { %6353 = vmatpush3.bf16.msra.mxu1 %v6352_v29 }
 0x829   : > { %6354 = vmatprep.subr.bf16.mxu1 %v6475_v2 }
 0x82c   : > { %6356 = vmatpush3.bf16.msra.mxu1 %v6355_v32 }
 0x82d   : > { %6357 = vmatprep.subr.bf16.mxu1 %v6475_v2 }
 0x830   : > { %6359 = vmatpush3.bf16.msra.mxu1 %v6358_v34 }
 0x833   : > { %6086 = vmatmul.mubr.msk.f32.vlgmr.msra.gmra.mrb[66].mxu1 %vm2424_vm2, %v4925_v37  ;;  %vm5100_vm2 = vcmask 0  }
 0x8c6   : > { %v4479_v38 = vpop.f32.mrb[58].mxu1  ;;  %v4624_v41 = vpop.f32.mrb[144].mxu0 }
 0x8c7   : > { %v5954_v42 = vpop.f32.mrb[59].mxu1  ;;  %v5992_v44 = vpop.f32.mrb[145].mxu0 }
 0x8d6   : > { %v4551_v45 = vpop.f32.mrb[60].mxu1  ;;  %v4772_v39 = vpop.f32.mrb[146].mxu0 }
 0x8d7   : > { %v4552_v43 = vadd.f32 %v4551_v45, %v4479_v38  ;;  %v5973_v46 = vpop.f32.mrb[61].mxu1  ;;  %v6030_v49 = vpop.f32.mrb[147].mxu0 }
 0x8d9   : > { %v4628_v50 = vadd.f32 %v4624_v41, %v4552_v43 }
 0x8e6   : > { %v4698_v47 = vpop.f32.mrb[62].mxu1  ;;  %v4920_v51 = vpop.f32.mrb[148].mxu0 }
 0x8e7   : > { %v4702_v52 = vadd.f32 %v4698_v47, %v4628_v50  ;;  %v6011_v53 = vpop.f32.mrb[63].mxu1  ;;  %v6068_v2 = vpop.f32.mrb[149].mxu0 }
 0x8e9   : > { %v4776_v54 = vadd.f32 %v4772_v39, %v4702_v52 }
 0x8f6   : > { %v4846_v55 = vpop.f32.mrb[64].mxu1  ;;  %v5068_v10 = vpop.f32.mrb[150].mxu0 }
 0x8f7   : > { %v4850_v56 = vadd.f32 %v4846_v55, %v4776_v54  ;;  %v6049_v57 = vpop.f32.mrb[65].mxu1  ;;  %v6106_v36 = vpop.f32.mrb[151].mxu0 }
 0x8f9   : > { %v4924_v58 = vadd.f32 %v4920_v51, %v4850_v56 }
 0x906   : > { %v4994_v59 = vpop.f32.mrb[66].mxu1 }
 0x907   : > { %v4998_v40 = vadd.f32 %v4994_v59, %v4924_v58  ;;  %v6087_v35 = vpop.f32.mrb[67].mxu1 }
 0x909   : > { %v5072_v61 = vadd.f32 %v5068_v10, %v4998_v40 }
 0x90b   : > { %v5074_v62 = vadd.f32 %v5073_v60, %v5072_v61 }
 0x90d   : > { %v5076_v0 = vmul.f32 0.2, %v5074_v62  ;;  %vm5075_vm0 = vcmp.ge.f32.partialorder %v5074_v62, 0.0 }
 0x90f   : > { %v5077_v3 = vsel %vm5075_vm0, %v5074_v62, %v5076_v0 }
 0x910   : > { %v5081_v4 = vmul.f32 %v5079_v63, %v5077_v3 }
 0x912   : > { %v5084_v6 = vadd.f32 %v5082_v1, %v5081_v4 }
 0x914   : > { %v5086_v7 = vmul.f32 %v5085_v5, %v5084_v6 }
 0x916   : > { %v5088_v8 = vsel %vm5087_vm1, %v5086_v7, 0.0 }
 0x917   : > { %5089 = vadd.xlane.f32.xlu0 %v5088_v8 }
 0x9a4   : > { %v5090_v12 = vpop.xlane.xlu0 %5089 }
 0x9a5   : > { %v5093_v13 = vadd.f32 %v5092_v11, %v5090_v12 }
 0x9a7   : > { %v5094_v14 = vsub.f32 0.0, %v5093_v13 }
 0x9a9   : > { %v5095_v15 = vmul.f32 1.442695, %v5094_v14 }
 0x9ab   : > { %6463 = vpow2.f32 %v5095_v15 }
 0x9b5   : > { %v6464_v16 = vpop.eup %6463 }
 0x9b6   : > { %v5097_v48 = vadd.f32 1.0, %v6464_v16 }
 0x9b8   : > { %6465 = vrcp.f32 %v5097_v48 }
 0x9c2   : > { %v6466_v17 = vpop.eup %6465 }
 0x9c3   : > { %5101 = vst.msk [vmem:[%s492_s22] sm:$0x1] %vm5100_vm2, %v6466_v17 }
 0x9c4 PF: > { %s27_s20 = sadd.s32 1, %s6473_s20  }
 0x9c5   : > { %p24_p4 = scmp.ge.s32.totalorder %s27_s20, 4  }
 0x9c7   :  { %26 = sbr.rel (!%p24_p4) target bundleno = 3 (0x3), region = 110 }

</bundles_post_ra>
